<compile_context>
chip_gen: v7x
topology: tpu7x:2x2x1
jax: 0.10.0
libtpu: 0.0.40
codegen_flags: <defaults>
</compile_context>

<pallas_src>
import numpy as np
import jax
import jax.numpy as jnp
from jax import lax
from jax.experimental import pallas as pl
from jax.experimental.pallas import tpu as pltpu

NEG_SLOPE = 0.01   # nn.LeakyReLU default negative_slope
BN_EPS = 1e-5      # nn.BatchNorm2d default eps

# 3x3 tap offsets, (kh, kw) row-major, as flat lane offsets (dh*W + dw) are built per-shape.
_TAPS = [(dh, dw) for dh in (-1, 0, 1) for dw in (-1, 0, 1)]


def _leaky(x):
    return jnp.where(x >= 0, x, NEG_SLOPE * x)


def _tap_masks(N, H, W):
    """(9, 1, N*H*W) f32 0/1 masks: mask[t] keeps column (n, h, w) iff the tap (dh, dw)
    reads a valid in-image pixel (handles h-, w- and image-boundary columns at once,
    including the lane positions that pltpu.roll wraps around)."""
    hw = H * W
    h = np.arange(hw) // W
    w = np.arange(hw) % W
    rows = []
    for dh, dw in _TAPS:
        valid = (h + dh >= 0) & (h + dh < H) & (w + dw >= 0) & (w + dw < W)
        rows.append(valid.astype(np.float32))
    m = np.stack(rows)                      # (9, HW) — same for every image
    m = np.tile(m, (1, N))                  # (9, N*HW)
    return jnp.asarray(m.reshape(9, 1, N * hw))


def _build_kernel(N, H, W, Cin, Cmid, Cout):
    L = N * H * W
    offs = [dh * W + dw for dh, dw in _TAPS]

    def kernel(x_ref, gamma_ref, beta_ref, mask_ref, w1_ref, b1_ref, w2_ref, b2_ref,
               o_ref, col_ref):
        # x_ref    : (Cin, L)        lane-dense, whole batch, single grid step
        # gamma_ref: (Cin, 1)   beta_ref: (Cin, 1)
        # mask_ref : (9, 1, L)       per-tap boundary masks (see _tap_masks)
        # w1_ref   : (9, Cmid, 1) if Cin == 1 (VPU path) else (Cmid, 9*Cin) (MXU path)
        # b1_ref   : (Cmid, 1)
        # w2_ref   : (Cout, 9*Cmid)
        # b2_ref   : (Cout, 1)
        # o_ref    : (Cout, L)       lane-dense output slab (unmasked stores)
        # col_ref  : (9*Cmid, L)     VMEM scratch: im2col slab for conv2

        # ---- BatchNorm2d (training mode), one-pass stats: var = E[x^2] - mean^2 ----
        x = x_ref[...].astype(jnp.float32)                                # (Cin, L)
        inv_cnt = 1.0 / float(L)
        mean = jnp.sum(x, axis=1, keepdims=True) * inv_cnt                # (Cin, 1)
        ex2 = jnp.sum(x * x, axis=1, keepdims=True) * inv_cnt             # (Cin, 1)
        var = ex2 - mean * mean
        scale = gamma_ref[...] * lax.rsqrt(var + BN_EPS)                  # (Cin, 1)
        shift = beta_ref[...] - mean * scale                              # (Cin, 1)
        xn = x * scale + shift                                            # (Cin, L)

        def tap(a, t):
            """Shifted + boundary-masked copy of a (C, L) map for tap t (XLU roll + 1 mul)."""
            off = offs[t]
            if off == 0:
                return a
            r = pltpu.roll(a, (-off) % L, axis=1)   # r[:, q] = a[:, (q + off) mod L]
            return r * mask_ref[t]                  # zero invalid (boundary / wrapped) cols

        # ---- Conv1: 3x3, stride 1, pad 1, + bias + LeakyReLU ----
        if Cin == 1:
            prods = [w1_ref[t] * tap(xn, t) for t in range(9)]   # (Cmid,1)*(1,L) -> VPU
            while len(prods) > 1:                                # tree reduce (short chain)
                nxt = [prods[i] + prods[i + 1] for i in range(0, len(prods) - 1, 2)]
                if len(prods) % 2:
                    nxt.append(prods[-1])
                prods = nxt
            acc1 = prods[0]                                      # (Cmid, L)
        else:
            acc1 = jnp.dot(w1_ref[...],
                           jnp.concatenate([tap(xn, t) for t in range(9)], axis=0),
                           preferred_element_type=jnp.float32)
        y1 = _leaky(acc1 + b1_ref[...])                          # (Cmid, L)

        # ---- Conv2: im2col slab written directly into VMEM scratch, one MXU matmul ----
        for t in range(9):
            col_ref[t * Cmid:(t + 1) * Cmid, :] = tap(y1, t)
        acc2 = jnp.dot(w2_ref[...], col_ref[...],
                       preferred_element_type=jnp.float32)       # (Cout, L), K = 9*Cmid
        y2 = _leaky(acc2 + b2_ref[...])

        o_ref[...] = y2.astype(o_ref.dtype)                      # lane-dense unmasked store

    return kernel


@jax.jit
def decode_block(x_nchw, gamma, beta, w1, b1, w2, b2):
    """x_nchw: (N, Cin, H, W) float32; w1/w2 in HWIO layout.  Returns (N, Cout, H, W)."""
    N, Cin, H, W = x_nchw.shape
    Cmid = w1.shape[3]
    Cout = w2.shape[3]
    L = N * H * W

    # (N, Cin, H, W) -> (Cin, N*H*W): channels on sublanes, batch*spatial lane-dense.
    x_cl = jnp.transpose(x_nchw, (1, 0, 2, 3)).reshape(Cin, L)

    if Cin == 1:
        w1_arg = w1.reshape(9, Cmid, 1)                          # per-tap (Cmid, 1) columns
        w1_spec = pl.BlockSpec((9, Cmid, 1), lambda i: (0, 0, 0))
    else:
        w1_arg = jnp.transpose(w1.reshape(9 * Cin, Cmid))        # (Cmid, 9*Cin)
        w1_spec = pl.BlockSpec((Cmid, 9 * Cin), lambda i: (0, 0))
    w2_arg = jnp.transpose(w2.reshape(9 * Cmid, Cout))           # (Cout, 9*Cmid)
    masks = _tap_masks(N, H, W)                                  # (9, 1, L)

    grid_spec = pltpu.PrefetchScalarGridSpec(
        num_scalar_prefetch=0,
        grid=(1,),                                               # single step: BN computed once
        in_specs=[
            pl.BlockSpec((Cin, L), lambda i: (0, 0)),
            pl.BlockSpec((Cin, 1), lambda i: (0, 0)),
            pl.BlockSpec((Cin, 1), lambda i: (0, 0)),
            pl.BlockSpec((9, 1, L), lambda i: (0, 0, 0)),
            w1_spec,
            pl.BlockSpec((Cmid, 1), lambda i: (0, 0)),
            pl.BlockSpec((Cout, 9 * Cmid), lambda i: (0, 0)),
            pl.BlockSpec((Cout, 1), lambda i: (0, 0)),
        ],
        out_specs=pl.BlockSpec((Cout, L), lambda i: (0, 0)),
        scratch_shapes=[pltpu.VMEM((9 * Cmid, L), jnp.float32)],  # im2col slab for conv2
    )

    out_cl = pl.pallas_call(
        _build_kernel(N, H, W, Cin, Cmid, Cout),
        out_shape=jax.ShapeDtypeStruct((Cout, L), x_nchw.dtype),
        grid_spec=grid_spec,
        compiler_params=pltpu.CompilerParams(
            dimension_semantics=("arbitrary",)),
    )(x_cl,
      gamma.reshape(Cin, 1).astype(jnp.float32),
      beta.reshape(Cin, 1).astype(jnp.float32),
      masks, w1_arg, b1.reshape(Cmid, 1), w2_arg, b2.reshape(Cout, 1))

    # (Cout, N*H*W) -> (N, Cout, H, W)   (tiny XLA transpose in the wrapper)
    return jnp.transpose(out_cl.reshape(Cout, N, H, W), (1, 0, 2, 3))


def reference_forward(x_nchw, gamma, beta, w1, b1, w2, b2):
    """Pure-JAX reference matching PyTorch semantics (NCHW data, HWIO weights)."""
    mean = jnp.mean(x_nchw, axis=(0, 2, 3), keepdims=True)
    var = jnp.mean(jnp.square(x_nchw - mean), axis=(0, 2, 3), keepdims=True)
    g = gamma[None, :, None, None]
    bt = beta[None, :, None, None]
    xn = (x_nchw - mean) * lax.rsqrt(var + BN_EPS) * g + bt
    dn = ('NCHW', 'HWIO', 'NCHW')
    y = lax.conv_general_dilated(xn, w1, (1, 1), 'SAME', dimension_numbers=dn)
    y = _leaky(y + b1[None, :, None, None])
    y = lax.conv_general_dilated(y, w2, (1, 1), 'SAME', dimension_numbers=dn)
    y = _leaky(y + b2[None, :, None, None])
    return y


if __name__ == "__main__":
    key = jax.random.PRNGKey(0)
    N, H, W = 2, 16, 16
    Cin, Cmid, Cout = 1, 16, 16          # DecodeBlock defaults: in=1, intermediate=16, out=16
    k = jax.random.split(key, 5)

    # NCHW input, same as the PyTorch module.
    x = jax.random.normal(k[0], (N, Cin, H, W), jnp.float32)

    # Deterministic parameter init (PyTorch defaults: BN weight=1, bias=0; conv weights/bias
    # ~ U(-1/sqrt(fan_in), 1/sqrt(fan_in))), built directly in HWIO layout.
    gamma = jnp.ones((Cin,), jnp.float32)
    beta = jnp.zeros((Cin,), jnp.float32)
    fan1 = float(Cin * 3 * 3)
    fan2 = float(Cmid * 3 * 3)
    w1 = jax.random.uniform(k[1], (3, 3, Cin, Cmid), jnp.float32, -1.0, 1.0) / jnp.sqrt(fan1)
    b1 = jax.random.uniform(k[2], (Cmid,), jnp.float32, -1.0, 1.0) / jnp.sqrt(fan1)
    w2 = jax.random.uniform(k[3], (3, 3, Cmid, Cout), jnp.float32, -1.0, 1.0) / jnp.sqrt(fan2)
    b2 = jax.random.uniform(k[4], (Cout,), jnp.float32, -1.0, 1.0) / jnp.sqrt(fan2)

    out = jax.block_until_ready(decode_block(x, gamma, beta, w1, b1, w2, b2))
    ref = reference_forward(x, gamma, beta, w1, b1, w2, b2)

    assert out.shape == (N, Cout, H, W), out.shape
    max_err = float(jnp.max(jnp.abs(out - ref)))
    assert jnp.allclose(out, ref, atol=1e-4, rtol=1e-4), f"max abs err {max_err}"
    print("KERNEL_OK")
</pallas_src>

<mosaic_0001>
module attributes {stable_mosaic.version = 11 : i64} {
  func.func @kernel(%arg0: i32, %arg1: memref<1x512xf32, #tpu.memory_space<vmem>>, %arg2: memref<1x1xf32, #tpu.memory_space<vmem>>, %arg3: memref<1x1xf32, #tpu.memory_space<vmem>>, %arg4: memref<9x1x512xf32, #tpu.memory_space<vmem>>, %arg5: memref<9x16x1xf32, #tpu.memory_space<vmem>>, %arg6: memref<16x1xf32, #tpu.memory_space<vmem>>, %arg7: memref<16x144xf32, #tpu.memory_space<vmem>>, %arg8: memref<16x1xf32, #tpu.memory_space<vmem>>, %arg9: memref<16x512xf32, #tpu.memory_space<vmem>>, %arg10: memref<144x512xf32, #tpu.memory_space<vmem>>) attributes {dimension_semantics = [#tpu.dimension_semantics<arbitrary>], iteration_bounds = array<i64: 1>, scalar_prefetch = 0 : i64, scratch_operands = 1 : i64, tpu.core_type = #tpu.core_type<tc>, window_params = [{pipeline_mode = #tpu.pipeline_mode<synchronous>, transform_indices = @transform_0, window_bounds = array<i64: 1, 512>}, {pipeline_mode = #tpu.pipeline_mode<synchronous>, transform_indices = @transform_1, window_bounds = array<i64: 1, 1>}, {pipeline_mode = #tpu.pipeline_mode<synchronous>, transform_indices = @transform_2, window_bounds = array<i64: 1, 1>}, {pipeline_mode = #tpu.pipeline_mode<synchronous>, transform_indices = @transform_3, window_bounds = array<i64: 9, 1, 512>}, {pipeline_mode = #tpu.pipeline_mode<synchronous>, transform_indices = @transform_4, window_bounds = array<i64: 9, 16, 1>}, {pipeline_mode = #tpu.pipeline_mode<synchronous>, transform_indices = @transform_5, window_bounds = array<i64: 16, 1>}, {pipeline_mode = #tpu.pipeline_mode<synchronous>, transform_indices = @transform_6, window_bounds = array<i64: 16, 144>}, {pipeline_mode = #tpu.pipeline_mode<synchronous>, transform_indices = @transform_7, window_bounds = array<i64: 16, 1>}, {pipeline_mode = #tpu.pipeline_mode<synchronous>, transform_indices = @transform_8, window_bounds = array<i64: 16, 512>}]} {
    %c0 = arith.constant 0 : index
    %c0_0 = arith.constant 0 : index
    %0 = vector.load %arg1[%c0, %c0_0] : memref<1x512xf32, #tpu.memory_space<vmem>>, vector<1x512xf32>
    %cst = arith.constant dense<0.000000e+00> : vector<1xf32>
    %1 = vector.multi_reduction <add>, %0, %cst [1] : vector<1x512xf32> to vector<1xf32>
    %2 = vector.shape_cast %1 : vector<1xf32> to vector<1x1xf32>
    %cst_1 = arith.constant 0.001953125 : f32
    %3 = vector.broadcast %cst_1 : f32 to vector<1x1xf32>
    %4 = arith.mulf %2, %3 : vector<1x1xf32>
    %5 = arith.mulf %0, %0 : vector<1x512xf32>
    %cst_2 = arith.constant dense<0.000000e+00> : vector<1xf32>
    %6 = vector.multi_reduction <add>, %5, %cst_2 [1] : vector<1x512xf32> to vector<1xf32>
    %7 = vector.shape_cast %6 : vector<1xf32> to vector<1x1xf32>
    %cst_3 = arith.constant 0.001953125 : f32
    %8 = vector.broadcast %cst_3 : f32 to vector<1x1xf32>
    %9 = arith.mulf %7, %8 : vector<1x1xf32>
    %10 = arith.mulf %4, %4 : vector<1x1xf32>
    %11 = arith.subf %9, %10 : vector<1x1xf32>
    %c0_4 = arith.constant 0 : index
    %c0_5 = arith.constant 0 : index
    %12 = vector.load %arg2[%c0_4, %c0_5] : memref<1x1xf32, #tpu.memory_space<vmem>>, vector<1x1xf32>
    %cst_6 = arith.constant 9.99999974E-6 : f32
    %13 = vector.broadcast %cst_6 : f32 to vector<1x1xf32>
    %14 = arith.addf %11, %13 : vector<1x1xf32>
    %15 = math.rsqrt %14 : vector<1x1xf32>
    %16 = arith.mulf %12, %15 : vector<1x1xf32>
    %c0_7 = arith.constant 0 : index
    %c0_8 = arith.constant 0 : index
    %17 = vector.load %arg3[%c0_7, %c0_8] : memref<1x1xf32, #tpu.memory_space<vmem>>, vector<1x1xf32>
    %18 = arith.mulf %4, %16 : vector<1x1xf32>
    %19 = arith.subf %17, %18 : vector<1x1xf32>
    %20 = vector.broadcast %16 : vector<1x1xf32> to vector<1x512xf32>
    %21 = arith.mulf %0, %20 : vector<1x512xf32>
    %22 = vector.broadcast %19 : vector<1x1xf32> to vector<1x512xf32>
    %23 = arith.addf %21, %22 : vector<1x512xf32>
    %c0_9 = arith.constant 0 : index
    %c0_10 = arith.constant 0 : index
    %c0_11 = arith.constant 0 : index
    %24 = vector.load %arg5[%c0_9, %c0_10, %c0_11] : memref<9x16x1xf32, #tpu.memory_space<vmem>>, vector<1x16x1xf32>
    %25 = vector.shape_cast %24 : vector<1x16x1xf32> to vector<16x1xf32>
    %c17_i32 = arith.constant 17 : i32
    %26 = tpu.dynamic_rotate %23 by %c17_i32 dim 1 : vector<1x512xf32>, i32 -> vector<1x512xf32>
    %c0_12 = arith.constant 0 : index
    %c0_13 = arith.constant 0 : index
    %c0_14 = arith.constant 0 : index
    %27 = vector.load %arg4[%c0_12, %c0_13, %c0_14] : memref<9x1x512xf32, #tpu.memory_space<vmem>>, vector<1x1x512xf32>
    %28 = vector.shape_cast %27 : vector<1x1x512xf32> to vector<1x512xf32>
    %29 = arith.mulf %26, %28 : vector<1x512xf32>
    %30 = vector.broadcast %25 : vector<16x1xf32> to vector<16x512xf32>
    %31 = vector.broadcast %29 : vector<1x512xf32> to vector<16x512xf32>
    %32 = arith.mulf %30, %31 : vector<16x512xf32>
    %c1 = arith.constant 1 : index
    %c0_15 = arith.constant 0 : index
    %c0_16 = arith.constant 0 : index
    %33 = vector.load %arg5[%c1, %c0_15, %c0_16] : memref<9x16x1xf32, #tpu.memory_space<vmem>>, vector<1x16x1xf32>
    %34 = vector.shape_cast %33 : vector<1x16x1xf32> to vector<16x1xf32>
    %c16_i32 = arith.constant 16 : i32
    %35 = tpu.dynamic_rotate %23 by %c16_i32 dim 1 : vector<1x512xf32>, i32 -> vector<1x512xf32>
    %c1_17 = arith.constant 1 : index
    %c0_18 = arith.constant 0 : index
    %c0_19 = arith.constant 0 : index
    %36 = vector.load %arg4[%c1_17, %c0_18, %c0_19] : memref<9x1x512xf32, #tpu.memory_space<vmem>>, vector<1x1x512xf32>
    %37 = vector.shape_cast %36 : vector<1x1x512xf32> to vector<1x512xf32>
    %38 = arith.mulf %35, %37 : vector<1x512xf32>
    %39 = vector.broadcast %34 : vector<16x1xf32> to vector<16x512xf32>
    %40 = vector.broadcast %38 : vector<1x512xf32> to vector<16x512xf32>
    %41 = arith.mulf %39, %40 : vector<16x512xf32>
    %c2 = arith.constant 2 : index
    %c0_20 = arith.constant 0 : index
    %c0_21 = arith.constant 0 : index
    %42 = vector.load %arg5[%c2, %c0_20, %c0_21] : memref<9x16x1xf32, #tpu.memory_space<vmem>>, vector<1x16x1xf32>
    %43 = vector.shape_cast %42 : vector<1x16x1xf32> to vector<16x1xf32>
    %c15_i32 = arith.constant 15 : i32
    %44 = tpu.dynamic_rotate %23 by %c15_i32 dim 1 : vector<1x512xf32>, i32 -> vector<1x512xf32>
    %c2_22 = arith.constant 2 : index
    %c0_23 = arith.constant 0 : index
    %c0_24 = arith.constant 0 : index
    %45 = vector.load %arg4[%c2_22, %c0_23, %c0_24] : memref<9x1x512xf32, #tpu.memory_space<vmem>>, vector<1x1x512xf32>
    %46 = vector.shape_cast %45 : vector<1x1x512xf32> to vector<1x512xf32>
    %47 = arith.mulf %44, %46 : vector<1x512xf32>
    %48 = vector.broadcast %43 : vector<16x1xf32> to vector<16x512xf32>
    %49 = vector.broadcast %47 : vector<1x512xf32> to vector<16x512xf32>
    %50 = arith.mulf %48, %49 : vector<16x512xf32>
    %c3 = arith.constant 3 : index
    %c0_25 = arith.constant 0 : index
    %c0_26 = arith.constant 0 : index
    %51 = vector.load %arg5[%c3, %c0_25, %c0_26] : memref<9x16x1xf32, #tpu.memory_space<vmem>>, vector<1x16x1xf32>
    %52 = vector.shape_cast %51 : vector<1x16x1xf32> to vector<16x1xf32>
    %c1_i32 = arith.constant 1 : i32
    %53 = tpu.dynamic_rotate %23 by %c1_i32 dim 1 : vector<1x512xf32>, i32 -> vector<1x512xf32>
    %c3_27 = arith.constant 3 : index
    %c0_28 = arith.constant 0 : index
    %c0_29 = arith.constant 0 : index
    %54 = vector.load %arg4[%c3_27, %c0_28, %c0_29] : memref<9x1x512xf32, #tpu.memory_space<vmem>>, vector<1x1x512xf32>
    %55 = vector.shape_cast %54 : vector<1x1x512xf32> to vector<1x512xf32>
    %56 = arith.mulf %53, %55 : vector<1x512xf32>
    %57 = vector.broadcast %52 : vector<16x1xf32> to vector<16x512xf32>
    %58 = vector.broadcast %56 : vector<1x512xf32> to vector<16x512xf32>
    %59 = arith.mulf %57, %58 : vector<16x512xf32>
    %c4 = arith.constant 4 : index
    %c0_30 = arith.constant 0 : index
    %c0_31 = arith.constant 0 : index
    %60 = vector.load %arg5[%c4, %c0_30, %c0_31] : memref<9x16x1xf32, #tpu.memory_space<vmem>>, vector<1x16x1xf32>
    %61 = vector.shape_cast %60 : vector<1x16x1xf32> to vector<16x1xf32>
    %62 = vector.broadcast %61 : vector<16x1xf32> to vector<16x512xf32>
    %63 = vector.broadcast %23 : vector<1x512xf32> to vector<16x512xf32>
    %64 = arith.mulf %62, %63 : vector<16x512xf32>
    %c5 = arith.constant 5 : index
    %c0_32 = arith.constant 0 : index
    %c0_33 = arith.constant 0 : index
    %65 = vector.load %arg5[%c5, %c0_32, %c0_33] : memref<9x16x1xf32, #tpu.memory_space<vmem>>, vector<1x16x1xf32>
    %66 = vector.shape_cast %65 : vector<1x16x1xf32> to vector<16x1xf32>
    %c511_i32 = arith.constant 511 : i32
    %67 = tpu.dynamic_rotate %23 by %c511_i32 dim 1 : vector<1x512xf32>, i32 -> vector<1x512xf32>
    %c5_34 = arith.constant 5 : index
    %c0_35 = arith.constant 0 : index
    %c0_36 = arith.constant 0 : index
    %68 = vector.load %arg4[%c5_34, %c0_35, %c0_36] : memref<9x1x512xf32, #tpu.memory_space<vmem>>, vector<1x1x512xf32>
    %69 = vector.shape_cast %68 : vector<1x1x512xf32> to vector<1x512xf32>
    %70 = arith.mulf %67, %69 : vector<1x512xf32>
    %71 = vector.broadcast %66 : vector<16x1xf32> to vector<16x512xf32>
    %72 = vector.broadcast %70 : vector<1x512xf32> to vector<16x512xf32>
    %73 = arith.mulf %71, %72 : vector<16x512xf32>
    %c6 = arith.constant 6 : index
    %c0_37 = arith.constant 0 : index
    %c0_38 = arith.constant 0 : index
    %74 = vector.load %arg5[%c6, %c0_37, %c0_38] : memref<9x16x1xf32, #tpu.memory_space<vmem>>, vector<1x16x1xf32>
    %75 = vector.shape_cast %74 : vector<1x16x1xf32> to vector<16x1xf32>
    %c497_i32 = arith.constant 497 : i32
    %76 = tpu.dynamic_rotate %23 by %c497_i32 dim 1 : vector<1x512xf32>, i32 -> vector<1x512xf32>
    %c6_39 = arith.constant 6 : index
    %c0_40 = arith.constant 0 : index
    %c0_41 = arith.constant 0 : index
    %77 = vector.load %arg4[%c6_39, %c0_40, %c0_41] : memref<9x1x512xf32, #tpu.memory_space<vmem>>, vector<1x1x512xf32>
    %78 = vector.shape_cast %77 : vector<1x1x512xf32> to vector<1x512xf32>
    %79 = arith.mulf %76, %78 : vector<1x512xf32>
    %80 = vector.broadcast %75 : vector<16x1xf32> to vector<16x512xf32>
    %81 = vector.broadcast %79 : vector<1x512xf32> to vector<16x512xf32>
    %82 = arith.mulf %80, %81 : vector<16x512xf32>
    %c7 = arith.constant 7 : index
    %c0_42 = arith.constant 0 : index
    %c0_43 = arith.constant 0 : index
    %83 = vector.load %arg5[%c7, %c0_42, %c0_43] : memref<9x16x1xf32, #tpu.memory_space<vmem>>, vector<1x16x1xf32>
    %84 = vector.shape_cast %83 : vector<1x16x1xf32> to vector<16x1xf32>
    %c496_i32 = arith.constant 496 : i32
    %85 = tpu.dynamic_rotate %23 by %c496_i32 dim 1 : vector<1x512xf32>, i32 -> vector<1x512xf32>
    %c7_44 = arith.constant 7 : index
    %c0_45 = arith.constant 0 : index
    %c0_46 = arith.constant 0 : index
    %86 = vector.load %arg4[%c7_44, %c0_45, %c0_46] : memref<9x1x512xf32, #tpu.memory_space<vmem>>, vector<1x1x512xf32>
    %87 = vector.shape_cast %86 : vector<1x1x512xf32> to vector<1x512xf32>
    %88 = arith.mulf %85, %87 : vector<1x512xf32>
    %89 = vector.broadcast %84 : vector<16x1xf32> to vector<16x512xf32>
    %90 = vector.broadcast %88 : vector<1x512xf32> to vector<16x512xf32>
    %91 = arith.mulf %89, %90 : vector<16x512xf32>
    %c8 = arith.constant 8 : index
    %c0_47 = arith.constant 0 : index
    %c0_48 = arith.constant 0 : index
    %92 = vector.load %arg5[%c8, %c0_47, %c0_48] : memref<9x16x1xf32, #tpu.memory_space<vmem>>, vector<1x16x1xf32>
    %93 = vector.shape_cast %92 : vector<1x16x1xf32> to vector<16x1xf32>
    %c495_i32 = arith.constant 495 : i32
    %94 = tpu.dynamic_rotate %23 by %c495_i32 dim 1 : vector<1x512xf32>, i32 -> vector<1x512xf32>
    %c8_49 = arith.constant 8 : index
    %c0_50 = arith.constant 0 : index
    %c0_51 = arith.constant 0 : index
    %95 = vector.load %arg4[%c8_49, %c0_50, %c0_51] : memref<9x1x512xf32, #tpu.memory_space<vmem>>, vector<1x1x512xf32>
    %96 = vector.shape_cast %95 : vector<1x1x512xf32> to vector<1x512xf32>
    %97 = arith.mulf %94, %96 : vector<1x512xf32>
    %98 = vector.broadcast %93 : vector<16x1xf32> to vector<16x512xf32>
    %99 = vector.broadcast %97 : vector<1x512xf32> to vector<16x512xf32>
    %100 = arith.mulf %98, %99 : vector<16x512xf32>
    %101 = arith.addf %32, %41 : vector<16x512xf32>
    %102 = arith.addf %50, %59 : vector<16x512xf32>
    %103 = arith.addf %64, %73 : vector<16x512xf32>
    %104 = arith.addf %82, %91 : vector<16x512xf32>
    %105 = arith.addf %101, %102 : vector<16x512xf32>
    %106 = arith.addf %103, %104 : vector<16x512xf32>
    %107 = arith.addf %105, %106 : vector<16x512xf32>
    %108 = arith.addf %107, %100 : vector<16x512xf32>
    %c0_52 = arith.constant 0 : index
    %c0_53 = arith.constant 0 : index
    %109 = vector.load %arg6[%c0_52, %c0_53] : memref<16x1xf32, #tpu.memory_space<vmem>>, vector<16x1xf32>
    %110 = vector.broadcast %109 : vector<16x1xf32> to vector<16x512xf32>
    %111 = arith.addf %108, %110 : vector<16x512xf32>
    %cst_54 = arith.constant 0.000000e+00 : f32
    %112 = vector.broadcast %cst_54 : f32 to vector<16x512xf32>
    %113 = arith.cmpf oge, %111, %112 : vector<16x512xf32>
    %cst_55 = arith.constant 0.00999999977 : f32
    %114 = vector.broadcast %cst_55 : f32 to vector<16x512xf32>
    %115 = arith.mulf %114, %111 : vector<16x512xf32>
    %116 = arith.select %113, %111, %115 : vector<16x512xi1>, vector<16x512xf32>
    %c17_i32_56 = arith.constant 17 : i32
    %117 = tpu.dynamic_rotate %116 by %c17_i32_56 dim 1 : vector<16x512xf32>, i32 -> vector<16x512xf32>
    %c0_57 = arith.constant 0 : index
    %c0_58 = arith.constant 0 : index
    %c0_59 = arith.constant 0 : index
    %118 = vector.load %arg4[%c0_57, %c0_58, %c0_59] : memref<9x1x512xf32, #tpu.memory_space<vmem>>, vector<1x1x512xf32>
    %119 = vector.shape_cast %118 : vector<1x1x512xf32> to vector<1x512xf32>
    %120 = vector.broadcast %119 : vector<1x512xf32> to vector<16x512xf32>
    %121 = arith.mulf %117, %120 : vector<16x512xf32>
    %c0_60 = arith.constant 0 : index
    %c0_61 = arith.constant 0 : index
    %122 = vector.load %arg10[%c0_60, %c0_61] : memref<144x512xf32, #tpu.memory_space<vmem>>, vector<16x512xf32>
    tpu.vector_store %arg10[%c0_60, %c0_61], %121 {strides = array<i32>} : memref<144x512xf32, #tpu.memory_space<vmem>>, vector<16x512xf32>,
    %c16_i32_62 = arith.constant 16 : i32
    %123 = tpu.dynamic_rotate %116 by %c16_i32_62 dim 1 : vector<16x512xf32>, i32 -> vector<16x512xf32>
    %c1_63 = arith.constant 1 : index
    %c0_64 = arith.constant 0 : index
    %c0_65 = arith.constant 0 : index
    %124 = vector.load %arg4[%c1_63, %c0_64, %c0_65] : memref<9x1x512xf32, #tpu.memory_space<vmem>>, vector<1x1x512xf32>
    %125 = vector.shape_cast %124 : vector<1x1x512xf32> to vector<1x512xf32>
    %126 = vector.broadcast %125 : vector<1x512xf32> to vector<16x512xf32>
    %127 = arith.mulf %123, %126 : vector<16x512xf32>
    %c16 = arith.constant 16 : index
    %c0_66 = arith.constant 0 : index
    %128 = vector.load %arg10[%c16, %c0_66] : memref<144x512xf32, #tpu.memory_space<vmem>>, vector<16x512xf32>
    tpu.vector_store %arg10[%c16, %c0_66], %127 {strides = array<i32>} : memref<144x512xf32, #tpu.memory_space<vmem>>, vector<16x512xf32>,
    %c15_i32_67 = arith.constant 15 : i32
    %129 = tpu.dynamic_rotate %116 by %c15_i32_67 dim 1 : vector<16x512xf32>, i32 -> vector<16x512xf32>
    %c2_68 = arith.constant 2 : index
    %c0_69 = arith.constant 0 : index
    %c0_70 = arith.constant 0 : index
    %130 = vector.load %arg4[%c2_68, %c0_69, %c0_70] : memref<9x1x512xf32, #tpu.memory_space<vmem>>, vector<1x1x512xf32>
    %131 = vector.shape_cast %130 : vector<1x1x512xf32> to vector<1x512xf32>
    %132 = vector.broadcast %131 : vector<1x512xf32> to vector<16x512xf32>
    %133 = arith.mulf %129, %132 : vector<16x512xf32>
    %c32 = arith.constant 32 : index
    %c0_71 = arith.constant 0 : index
    %134 = vector.load %arg10[%c32, %c0_71] : memref<144x512xf32, #tpu.memory_space<vmem>>, vector<16x512xf32>
    tpu.vector_store %arg10[%c32, %c0_71], %133 {strides = array<i32>} : memref<144x512xf32, #tpu.memory_space<vmem>>, vector<16x512xf32>,
    %c1_i32_72 = arith.constant 1 : i32
    %135 = tpu.dynamic_rotate %116 by %c1_i32_72 dim 1 : vector<16x512xf32>, i32 -> vector<16x512xf32>
    %c3_73 = arith.constant 3 : index
    %c0_74 = arith.constant 0 : index
    %c0_75 = arith.constant 0 : index
    %136 = vector.load %arg4[%c3_73, %c0_74, %c0_75] : memref<9x1x512xf32, #tpu.memory_space<vmem>>, vector<1x1x512xf32>
    %137 = vector.shape_cast %136 : vector<1x1x512xf32> to vector<1x512xf32>
    %138 = vector.broadcast %137 : vector<1x512xf32> to vector<16x512xf32>
    %139 = arith.mulf %135, %138 : vector<16x512xf32>
    %c48 = arith.constant 48 : index
    %c0_76 = arith.constant 0 : index
    %140 = vector.load %arg10[%c48, %c0_76] : memref<144x512xf32, #tpu.memory_space<vmem>>, vector<16x512xf32>
    tpu.vector_store %arg10[%c48, %c0_76], %139 {strides = array<i32>} : memref<144x512xf32, #tpu.memory_space<vmem>>, vector<16x512xf32>,
    %c64 = arith.constant 64 : index
    %c0_77 = arith.constant 0 : index
    %141 = vector.load %arg10[%c64, %c0_77] : memref<144x512xf32, #tpu.memory_space<vmem>>, vector<16x512xf32>
    tpu.vector_store %arg10[%c64, %c0_77], %116 {strides = array<i32>} : memref<144x512xf32, #tpu.memory_space<vmem>>, vector<16x512xf32>,
    %c511_i32_78 = arith.constant 511 : i32
    %142 = tpu.dynamic_rotate %116 by %c511_i32_78 dim 1 : vector<16x512xf32>, i32 -> vector<16x512xf32>
    %c5_79 = arith.constant 5 : index
    %c0_80 = arith.constant 0 : index
    %c0_81 = arith.constant 0 : index
    %143 = vector.load %arg4[%c5_79, %c0_80, %c0_81] : memref<9x1x512xf32, #tpu.memory_space<vmem>>, vector<1x1x512xf32>
    %144 = vector.shape_cast %143 : vector<1x1x512xf32> to vector<1x512xf32>
    %145 = vector.broadcast %144 : vector<1x512xf32> to vector<16x512xf32>
    %146 = arith.mulf %142, %145 : vector<16x512xf32>
    %c80 = arith.constant 80 : index
    %c0_82 = arith.constant 0 : index
    %147 = vector.load %arg10[%c80, %c0_82] : memref<144x512xf32, #tpu.memory_space<vmem>>, vector<16x512xf32>
    tpu.vector_store %arg10[%c80, %c0_82], %146 {strides = array<i32>} : memref<144x512xf32, #tpu.memory_space<vmem>>, vector<16x512xf32>,
    %c497_i32_83 = arith.constant 497 : i32
    %148 = tpu.dynamic_rotate %116 by %c497_i32_83 dim 1 : vector<16x512xf32>, i32 -> vector<16x512xf32>
    %c6_84 = arith.constant 6 : index
    %c0_85 = arith.constant 0 : index
    %c0_86 = arith.constant 0 : index
    %149 = vector.load %arg4[%c6_84, %c0_85, %c0_86] : memref<9x1x512xf32, #tpu.memory_space<vmem>>, vector<1x1x512xf32>
    %150 = vector.shape_cast %149 : vector<1x1x512xf32> to vector<1x512xf32>
    %151 = vector.broadcast %150 : vector<1x512xf32> to vector<16x512xf32>
    %152 = arith.mulf %148, %151 : vector<16x512xf32>
    %c96 = arith.constant 96 : index
    %c0_87 = arith.constant 0 : index
    %153 = vector.load %arg10[%c96, %c0_87] : memref<144x512xf32, #tpu.memory_space<vmem>>, vector<16x512xf32>
    tpu.vector_store %arg10[%c96, %c0_87], %152 {strides = array<i32>} : memref<144x512xf32, #tpu.memory_space<vmem>>, vector<16x512xf32>,
    %c496_i32_88 = arith.constant 496 : i32
    %154 = tpu.dynamic_rotate %116 by %c496_i32_88 dim 1 : vector<16x512xf32>, i32 -> vector<16x512xf32>
    %c7_89 = arith.constant 7 : index
    %c0_90 = arith.constant 0 : index
    %c0_91 = arith.constant 0 : index
    %155 = vector.load %arg4[%c7_89, %c0_90, %c0_91] : memref<9x1x512xf32, #tpu.memory_space<vmem>>, vector<1x1x512xf32>
    %156 = vector.shape_cast %155 : vector<1x1x512xf32> to vector<1x512xf32>
    %157 = vector.broadcast %156 : vector<1x512xf32> to vector<16x512xf32>
    %158 = arith.mulf %154, %157 : vector<16x512xf32>
    %c112 = arith.constant 112 : index
    %c0_92 = arith.constant 0 : index
    %159 = vector.load %arg10[%c112, %c0_92] : memref<144x512xf32, #tpu.memory_space<vmem>>, vector<16x512xf32>
    tpu.vector_store %arg10[%c112, %c0_92], %158 {strides = array<i32>} : memref<144x512xf32, #tpu.memory_space<vmem>>, vector<16x512xf32>,
    %c495_i32_93 = arith.constant 495 : i32
    %160 = tpu.dynamic_rotate %116 by %c495_i32_93 dim 1 : vector<16x512xf32>, i32 -> vector<16x512xf32>
    %c8_94 = arith.constant 8 : index
    %c0_95 = arith.constant 0 : index
    %c0_96 = arith.constant 0 : index
    %161 = vector.load %arg4[%c8_94, %c0_95, %c0_96] : memref<9x1x512xf32, #tpu.memory_space<vmem>>, vector<1x1x512xf32>
    %162 = vector.shape_cast %161 : vector<1x1x512xf32> to vector<1x512xf32>
    %163 = vector.broadcast %162 : vector<1x512xf32> to vector<16x512xf32>
    %164 = arith.mulf %160, %163 : vector<16x512xf32>
    %c128 = arith.constant 128 : index
    %c0_97 = arith.constant 0 : index
    %165 = vector.load %arg10[%c128, %c0_97] : memref<144x512xf32, #tpu.memory_space<vmem>>, vector<16x512xf32>
    tpu.vector_store %arg10[%c128, %c0_97], %164 {strides = array<i32>} : memref<144x512xf32, #tpu.memory_space<vmem>>, vector<16x512xf32>,
    %c0_98 = arith.constant 0 : index
    %c0_99 = arith.constant 0 : index
    %166 = vector.load %arg7[%c0_98, %c0_99] : memref<16x144xf32, #tpu.memory_space<vmem>>, vector<16x144xf32>
    %c0_100 = arith.constant 0 : index
    %c0_101 = arith.constant 0 : index
    %167 = vector.load %arg10[%c0_100, %c0_101] : memref<144x512xf32, #tpu.memory_space<vmem>>, vector<144x512xf32>
    %cst_102 = arith.constant dense<0.000000e+00> : vector<16x512xf32>
    %168 = tpu.matmul %166, %167, %cst_102 {dimension_numbers = #tpu.dot_dimension_numbers<[1], [0], [0], [1], [0, 0, 1, 1], [], []>} : vector<16x144xf32>, vector<144x512xf32>, vector<16x512xf32> -> vector<16x512xf32>
    %c0_103 = arith.constant 0 : index
    %c0_104 = arith.constant 0 : index
    %169 = vector.load %arg8[%c0_103, %c0_104] : memref<16x1xf32, #tpu.memory_space<vmem>>, vector<16x1xf32>
    %170 = vector.broadcast %169 : vector<16x1xf32> to vector<16x512xf32>
    %171 = arith.addf %168, %170 : vector<16x512xf32>
    %cst_105 = arith.constant 0.000000e+00 : f32
    %172 = vector.broadcast %cst_105 : f32 to vector<16x512xf32>
    %173 = arith.cmpf oge, %171, %172 : vector<16x512xf32>
    %cst_106 = arith.constant 0.00999999977 : f32
    %174 = vector.broadcast %cst_106 : f32 to vector<16x512xf32>
    %175 = arith.mulf %174, %171 : vector<16x512xf32>
    %176 = arith.select %173, %171, %175 : vector<16x512xi1>, vector<16x512xf32>
    %c0_107 = arith.constant 0 : index
    %c0_108 = arith.constant 0 : index
    %177 = vector.load %arg9[%c0_107, %c0_108] : memref<16x512xf32, #tpu.memory_space<vmem>>, vector<16x512xf32>
    tpu.vector_store %arg9[%c0_107, %c0_108], %176 {strides = array<i32>} : memref<16x512xf32, #tpu.memory_space<vmem>>, vector<16x512xf32>,
    return
  }
  func.func @transform_0(%arg0: i32) -> (i32, i32) {
    %c0_i32 = arith.constant 0 : i32
    %c0_i32_0 = arith.constant 0 : i32
    %c0_i32_1 = arith.constant 0 : i32
    return %c0_i32, %c0_i32_0 : i32, i32
  }
  func.func @transform_1(%arg0: i32) -> (i32, i32) {
    %c0_i32 = arith.constant 0 : i32
    %c0_i32_0 = arith.constant 0 : i32
    %c0_i32_1 = arith.constant 0 : i32
    return %c0_i32, %c0_i32_0 : i32, i32
  }
  func.func @transform_2(%arg0: i32) -> (i32, i32) {
    %c0_i32 = arith.constant 0 : i32
    %c0_i32_0 = arith.constant 0 : i32
    %c0_i32_1 = arith.constant 0 : i32
    return %c0_i32, %c0_i32_0 : i32, i32
  }
  func.func @transform_3(%arg0: i32) -> (i32, i32, i32) {
    %c0_i32 = arith.constant 0 : i32
    %c0_i32_0 = arith.constant 0 : i32
    %c0_i32_1 = arith.constant 0 : i32
    %c0_i32_2 = arith.constant 0 : i32
    return %c0_i32, %c0_i32_0, %c0_i32_1 : i32, i32, i32
  }
  func.func @transform_4(%arg0: i32) -> (i32, i32, i32) {
    %c0_i32 = arith.constant 0 : i32
    %c0_i32_0 = arith.constant 0 : i32
    %c0_i32_1 = arith.constant 0 : i32
    %c0_i32_2 = arith.constant 0 : i32
    return %c0_i32, %c0_i32_0, %c0_i32_1 : i32, i32, i32
  }
  func.func @transform_5(%arg0: i32) -> (i32, i32) {
    %c0_i32 = arith.constant 0 : i32
    %c0_i32_0 = arith.constant 0 : i32
    %c0_i32_1 = arith.constant 0 : i32
    return %c0_i32, %c0_i32_0 : i32, i32
  }
  func.func @transform_6(%arg0: i32) -> (i32, i32) {
    %c0_i32 = arith.constant 0 : i32
    %c0_i32_0 = arith.constant 0 : i32
    %c0_i32_1 = arith.constant 0 : i32
    return %c0_i32, %c0_i32_0 : i32, i32
  }
  func.func @transform_7(%arg0: i32) -> (i32, i32) {
    %c0_i32 = arith.constant 0 : i32
    %c0_i32_0 = arith.constant 0 : i32
    %c0_i32_1 = arith.constant 0 : i32
    return %c0_i32, %c0_i32_0 : i32, i32
  }
  func.func @transform_8(%arg0: i32) -> (i32, i32) {
    %c0_i32 = arith.constant 0 : i32
    %c0_i32_0 = arith.constant 0 : i32
    %c0_i32_1 = arith.constant 0 : i32
    return %c0_i32, %c0_i32_0 : i32, i32
  }
}

</mosaic_0001>

<bundles_post_ra>
// kernel: decode_block.1
= control target key start
LH: loop header
LB: loop body
LE: loop exit
PB: predicated region body
PF: predicated region fallthrough
CT: control target
= control target key end

     0   :  { %v35_v0 = vlaneseq  ;;  %v1779_v1 = vmov 0   ;;  %vm55_vm0 = vcmask 1040384   ;;  %s1782_s25 = smov 15   ;;  %s1783_s26 = smov 1   ;;  %s2883_s0 = inlined_call_operand.vmem [shape: f32[1,512], index: 0, kind: input, shape index: {}]   ;;  %s2884_s4 = inlined_call_operand.vmem [shape: f32[9,16,1], index: 4, kind: input, shape index: {}]   ;;  %s2885_s1 = inlined_call_operand.<no memory space> [shape: f32[1,1], index: 1, kind: input, shape index: {}]   ;;  %s2886_s2 = inlined_call_operand.<no memory space> [shape: f32[1,1], index: 2, kind: input, shape index: {}]   ;;  %s2887_s5 = inlined_call_operand.vmem [shape: f32[16,1], index: 5, kind: input, shape index: {}]   ;;  %s2888_s3 = inlined_call_operand.vmem [shape: f32[9,1,512], index: 3, kind: input, shape index: {}]   ;;  %s2889_s6 = inlined_call_operand.vmem [shape: f32[16,144], index: 6, kind: input, shape index: {}]   ;;  %s2890_s7 = inlined_call_operand.vmem [shape: f32[16,1], index: 7, kind: input, shape index: {}]   ;;  %s2891_s8 = inlined_call_operand.vmem [shape: f32[16,512], index: 8, kind: output, shape index: {}]  }
   0x1   :  { %1776 = vset.pattern.permute.xlu1 %v1779_v1  ;;  %v128_v2 = vld [vmem:[%s2884_s4 + $0x8] sm:$0xff]  ;;  %1775 = vset.pattern.permute.xlu0 %v1779_v1  ;;  %v1839_v3 = vld [vmem:[%s2883_s0] sm:$0xf]  ;;  %v1660_v6 = vld [vmem:[%s2884_s4 + $0x10] sm:$0xff]  ;;  %v13_v42 = vstv %s2885_s1  ;;  %s1784_s27 = smov 127   ;;  %s1785_s28 = smov 113  }
   0x2   :  { %v36_v4 = vshrl.u32 %v35_v0, 7  ;;  %198 = vperm.xlu1 %1776, %v128_v2   ;;  %v66_v5 = vmul.f32 %v1839_v3, %v1839_v3  ;;  %v1661_v18 = vld [vmem:[%s2884_s4 + $0x18] sm:$0xff]  ;;  %v1663_v30 = vld [vmem:[%s2884_s4 + $0x20] sm:$0xff]  ;;  %v1664_v35 = vld [vmem:[%s2884_s4 + $0x28] sm:$0xff]  ;;  %14 = vst [vmem:[#allocation3] sm:$0x1] %v13_v42  ;;  %v15_v44 = vstv %s2886_s2 }
   0x3   :  { %v1666_v36 = vld [vmem:[%s2884_s4 + $0x30] sm:$0xff]  ;;  %v1667_v37 = vld [vmem:[%s2884_s4 + $0x38] sm:$0xff]  ;;  %v1669_v38 = vld [vmem:[%s2884_s4 + $0x40] sm:$0xff]  ;;  %16 = vst [vmem:[#allocation4] sm:$0x1] %v15_v44  ;;  %s1786_s29 = smov 112  }
   0x4   :  { %v1847_v7 = vsub.s32 0, %v36_v4  ;;  %v1849_v8 = vsub.s32 1, %v36_v4  ;;  %v1851_v9 = vsub.s32 2, %v36_v4  ;;  %v1853_v10 = vsub.s32 3, %v36_v4  ;;  %v1670_v39 = vld [vmem:[%s2884_s4 + $0x48] sm:$0xff]  ;;  %v1671_v40 = vld [vmem:[%s2884_s4 + $0x50] sm:$0xff] }
   0x5   :  { %v1672_v41 = vld [vmem:[%s2884_s4 + $0x58] sm:$0xff]  ;;  %v1675_v43 = vld [vmem:[%s2884_s4 + $0x68] sm:$0xff]  ;;  %v127_v48 = vld [vmem:[%s2884_s4] sm:$0xff]  ;;  %s1787_s30 = smov 111  }
   0x6   :  { %v38_v11 = vrot.slane %v1839_v3, %v1847_v7  ;;  %v42_v12 = vrot.slane %v1839_v3, %v1849_v8  ;;  %v46_v13 = vrot.slane %v1839_v3, %v1851_v9  ;;  %v50_v14 = vrot.slane %v1839_v3, %v1853_v10  ;;  %270 = vperm.xlu1 %1776, %v1660_v6   ;;  %v1678_v45 = vld [vmem:[%s2884_s4 + $0x78] sm:$0xff]  ;;  %v1681_v46 = vld [vmem:[%s2884_s4 + $0x88] sm:$0xff]  ;;  %v1674_v49 = vld [vmem:[%s2884_s4 + $0x60] sm:$0xff] }
   0x7   :  { %v71_v15 = vrot.slane %v66_v5, %v1847_v7  ;;  %v75_v16 = vrot.slane %v66_v5, %v1849_v8  ;;  %v79_v17 = vrot.slane %v66_v5, %v1851_v9  ;;  %v83_v22 = vrot.slane %v66_v5, %v1853_v10  ;;  %v850_v47 = vld [vmem:[%s2887_s5 + $0x8] sm:$0xff]  ;;  %v1677_v50 = vld [vmem:[%s2884_s4 + $0x70] sm:$0xff]  ;;  %v1680_v51 = vld [vmem:[%s2884_s4 + $0x80] sm:$0xff]  ;;  %s1780_s4 = smov 17  }
   0x8   :  { %v56_v19 = vsel %vm55_vm0, %v38_v11, 0.0  ;;  %v57_v20 = vsel %vm55_vm0, %v42_v12, 0.0  ;;  %v59_v21 = vsel %vm55_vm0, %v46_v13, 0.0  ;;  %v61_v27 = vsel %vm55_vm0, %v50_v14, 0.0  ;;  %v849_v52 = vld [vmem:[%s2887_s5] sm:$0xff]  ;;  %s1781_s5 = smov 16  }
   0x9   :  { %v58_v23 = vadd.f32 %v57_v20, %v56_v19  ;;  %v88_v24 = vsel %vm55_vm0, %v71_v15, 0.0  ;;  %v89_v25 = vsel %vm55_vm0, %v75_v16, 0.0  ;;  %v91_v26 = vsel %vm55_vm0, %v79_v17, 0.0  ;;  %v100_v60 = vld [vmem:[#allocation3] sm:$0x1] }
   0xa   :  { %v90_v28 = vadd.f32 %v89_v25, %v88_v24  ;;  %275 = vperm.xlu1 %1776, %v1661_v18   ;;  %v93_v32 = vsel %vm55_vm0, %v83_v22, 0.0  ;;  %v104_v63 = vld [vmem:[#allocation4] sm:$0x1]  ;;  %v2066_v44 = vld [vmem:[%s2888_s3 + $0x4] sm:$0xf] }
   0xb   :  { %v60_v29 = vadd.f32 %v59_v21, %v58_v23  ;;  %v165_v42 = vld [vmem:[%s2888_s3] sm:$0xf] }
   0xc   :  { %v92_v31 = vadd.f32 %v91_v26, %v90_v28 }
   0xd   :  { %v62_v33 = vadd.f32 %v61_v27, %v60_v29 }
   0xe   :  { %347 = vperm.xlu1 %1776, %v1663_v30   ;;  %v94_v34 = vadd.f32 %v93_v32, %v92_v31 }
   0xf   :  { %63 = vadd.xlane.f32.xlu0 %v62_v33 }
  0x12   :  { %352 = vperm.xlu1 %1776, %v1664_v35  }
  0x13   :  { %95 = vadd.xlane.f32.xlu0 %v94_v34 }
  0x16   :  { %424 = vperm.xlu1 %1776, %v1666_v36  }
  0x1a   :  { %429 = vperm.xlu1 %1776, %v1667_v37  }
  0x1e   :  { %461 = vperm.xlu1 %1776, %v1669_v38   ;;  %v2055_v38 = vand.u32 127, %v35_v0  ;;  %v2069_v0 = vrot.slane %v165_v42, %v1849_v8 }
  0x20   :  { %vm160_vm1 = vcmp.lt.s32.totalorder %v2055_v38, 17  ;;  %2904 = vst [vmem:[#allocation7_spill] sm:$0xff] %v2069_v0  ;;  %vm236_vm2 = vcmp.lt.s32.totalorder %v2055_v38, 16  ;;  %vm313_vm3 = vcmp.lt.s32.totalorder %v2055_v38, 15  ;;  %vm390_vm4 = vcmp.lt.s32.totalorder %v2055_v38, 1 }
  0x21   :  { %vm488_vm5 = vcmp.lt.s32.totalorder %v2055_v38, 127  ;;  %vm565_vm6 = vcmp.lt.s32.totalorder %v2055_v38, 113  ;;  %vm642_vm7 = vcmp.lt.s32.totalorder %v2055_v38, 112  ;;  %vm719_vm8 = vcmp.lt.s32.totalorder %v2055_v38, 111  ;;  %v1377_v38 = vld [vmem:[%s2889_s6 + $0x10] sm:$0xff] }
  0x22   :  { %466 = vperm.xlu1 %1776, %v1670_v39  }
  0x26   :  { %522 = vperm.xlu1 %1776, %v1671_v40  }
  0x29   :  { %193 = vperm.xlu0 %1775, %v127_v48  }
  0x2a   :  { %527 = vperm.xlu1 %1776, %v1672_v41  }
  0x2d   :  { %599 = vperm.xlu0 %1775, %v1674_v49  }
  0x2e   :  { %604 = vperm.xlu1 %1776, %v1675_v43  }
  0x31   :  { %676 = vperm.xlu0 %1775, %v1677_v50   ;;  %v251_v50 = vrot.slane %v2066_v44, %v1849_v8 }
  0x32   :  { %681 = vperm.xlu1 %1776, %v1678_v45   ;;  %v2072_v45 = vrot.slane %v165_v42, %v1847_v7 }
  0x34   :  { %2905 = vst [vmem:[#allocation8_spill] sm:$0xff] %v2072_v45 }
  0x35   :  { %753 = vperm.xlu0 %1775, %v1680_v51   ;;  %v247_v51 = vrot.slane %v2066_v44, %v1847_v7 }
  0x36   :  { %758 = vperm.xlu1 %1776, %v1681_v46   ;;  %v2075_v46 = vrot.slane %v165_v42, %v1851_v9 }
  0x38   :  { %2906 = vst [vmem:[#allocation9_spill] sm:$0xff] %v2075_v46 }
  0x39   :  { %853 = vperm.xlu0 %1775, %v849_v52   ;;  %v255_v52 = vrot.slane %v2066_v44, %v1851_v9 }
  0x3a   :  { %858 = vperm.xlu1 %1776, %v850_v47   ;;  %v2078_v47 = vrot.slane %v165_v42, %v1853_v10 }
  0x3c   :  { %2907 = vst [vmem:[#allocation10_spill] sm:$0xff] %v2078_v47 }
  0x81   :  { %v1935_v4 = vpop.permute.xlu1 %198 }
  0x85   :  { %v1937_v5 = vpop.permute.xlu1 %270 }
  0x89   :  { %v1939_v6 = vpop.permute.xlu1 %275 }
  0x8d   :  { %v1941_v11 = vpop.permute.xlu1 %347 }
  0x91   :  { %v1943_v12 = vpop.permute.xlu1 %352 }
  0x95   :  { %v1945_v13 = vpop.permute.xlu1 %424 }
  0x99   :  { %v1947_v14 = vpop.permute.xlu1 %429 }
  0x9c   :  { %v64_v53 = vpop.xlane.xlu0 %63 }
  0x9d   :  { %v65_v54 = vmul.f32 0.001953125, %v64_v53  ;;  %v1949_v15 = vpop.permute.xlu1 %461  ;;  %v2090_v53 = vld [vmem:[%s2888_s3 + $0x8] sm:$0xf] }
  0x9f   :  { %v98_v56 = vmul.f32 %v65_v54, %v65_v54 }
  0xa0   :  { %v96_v55 = vpop.xlane.xlu0 %95 }
  0xa1   :  { %v97_v57 = vmul.f32 0.001953125, %v96_v55  ;;  %v1951_v16 = vpop.permute.xlu1 %466  ;;  %v2097_v55 = vld [vmem:[%s2888_s3 + $0xc] sm:$0xf] }
  0xa3   :  { %v99_v58 = vsub.f32 %v97_v57, %v98_v56 }
  0xa5   :  { %v101_v59 = vadd.f32 1e-05, %v99_v58  ;;  %v1953_v17 = vpop.permute.xlu1 %522 }
  0xa7   :  { %1777 = vrsqrt.f32 %v101_v59 }
  0xa8   :  { %v2044_v32 = vpop.permute.xlu0 %193 }
  0xa9   :  { %v1955_v18 = vpop.permute.xlu1 %527 }
  0xac   :  { %v2046_v33 = vpop.permute.xlu0 %599 }
  0xad   :  { %v1957_v19 = vpop.permute.xlu1 %604 }
  0xb0   :  { %v2048_v34 = vpop.permute.xlu0 %676 }
  0xb1   :  { %v1778_v61 = vpop.eup %1777  ;;  %v1959_v20 = vpop.permute.xlu1 %681 }
  0xb2   :  { %v103_v62 = vmul.f32 %v1778_v61, %v100_v60 }
  0xb4   :  { %109 = vperm.xlu1 %1776, %v103_v62   ;;  %v105_v1 = vmul.f32 %v103_v62, %v65_v54  ;;  %v2050_v35 = vpop.permute.xlu0 %753 }
  0xb5   :  { %v1961_v21 = vpop.permute.xlu1 %758 }
  0xb6   :  { %v106_v2 = vsub.f32 %v104_v63, %v105_v1 }
  0xb8   :  { %119 = vperm.xlu1 %1776, %v106_v2   ;;  %v2052_v36 = vpop.permute.xlu0 %853 }
  0xb9   :  { %v1963_v22 = vpop.permute.xlu1 %858  ;;  %2903 = vst [vmem:[#allocation6_spill] sm:$0xff] %v2052_v36  ;;  %v2918_v36 = vrot.slane %v2097_v55, %v1851_v9 }
  0xba   :  { %2902 = vst [vmem:[#allocation5_spill] sm:$0xff] %v1963_v22 }
 0x133   :  { %v110_v23 = vpop.permute.xlu1 %109 }
 0x134   :  { %v115_v24 = vrot.slane %v110_v23, %v1847_v7 }
 0x136   :  { %v116_v26 = vmul.f32 %v115_v24, %v1839_v3 }
 0x137   :  { %v120_v25 = vpop.permute.xlu1 %119 }
 0x138   :  { %v125_v27 = vrot.slane %v120_v25, %v1847_v7 }
 0x13a   :  { %v126_v28 = vadd.f32 %v125_v27, %v116_v26 }
 0x13c   :  { %v1969_v29 = vrot.slane %v126_v28, %v1847_v7  ;;  %v1972_v30 = vrot.slane %v126_v28, %v1849_v8  ;;  %v1979_v31 = vrot.slane %v126_v28, %v1851_v9  ;;  %v1982_v3 = vrot.slane %v126_v28, %v1853_v10 }
 0x13e   :  { %152 = vrot.lane.b32.xlu1 %v1972_v30, %s1780_s4  ;;  %150 = vrot.lane.b32.xlu0 %v1969_v29, %s1780_s4  ;;  %v2101_v56 = vmul.f32 %v1949_v15, %v1969_v29  ;;  %v2105_v57 = vmul.f32 %v1951_v16, %v1969_v29  ;;  %v2109_v58 = vmul.f32 %v1949_v15, %v1982_v3 }
 0x13f   :  { %v2113_v59 = vmul.f32 %v1951_v16, %v1982_v3  ;;  %v2117_v60 = vmul.f32 %v1949_v15, %v1972_v30  ;;  %v2121_v61 = vmul.f32 %v1949_v15, %v1979_v31  ;;  %v2125_v62 = vmul.f32 %v1951_v16, %v1972_v30  ;;  %v2136_v15 = vld [vmem:[%s2888_s3 + $0x14] sm:$0xf] }
 0x140   :  { %v2140_v25 = vmul.f32 %v1951_v16, %v1979_v31 }
 0x141   :  { %2908 = vst [vmem:[#allocation11_spill] sm:$0xff] %v2117_v60  ;;  %2909 = vst [vmem:[#allocation12_spill] sm:$0xff] %v2125_v62 }
 0x142   :  { %156 = vrot.lane.b32.xlu1 %v1982_v3, %s1780_s4  ;;  %154 = vrot.lane.b32.xlu0 %v1979_v31, %s1780_s4 }
 0x146   :  { %230 = vrot.lane.b32.xlu1 %v1972_v30, %s1781_s5  ;;  %228 = vrot.lane.b32.xlu0 %v1969_v29, %s1781_s5 }
 0x14a   :  { %234 = vrot.lane.b32.xlu1 %v1982_v3, %s1781_s5  ;;  %232 = vrot.lane.b32.xlu0 %v1979_v31, %s1781_s5 }
 0x14e   :  { %307 = vrot.lane.b32.xlu1 %v1972_v30, %s1782_s25  ;;  %305 = vrot.lane.b32.xlu0 %v1969_v29, %s1782_s25 }
 0x152   :  { %311 = vrot.lane.b32.xlu1 %v1982_v3, %s1782_s25  ;;  %309 = vrot.lane.b32.xlu0 %v1979_v31, %s1782_s25 }
 0x156   :  { %384 = vrot.lane.b32.xlu1 %v1972_v30, %s1783_s26  ;;  %382 = vrot.lane.b32.xlu0 %v1969_v29, %s1783_s26 }
 0x15a   :  { %388 = vrot.lane.b32.xlu1 %v1982_v3, %s1783_s26  ;;  %386 = vrot.lane.b32.xlu0 %v1979_v31, %s1783_s26 }
 0x15e   :  { %482 = vrot.lane.b32.xlu1 %v1972_v30, %s1784_s27  ;;  %480 = vrot.lane.b32.xlu0 %v1969_v29, %s1784_s27 }
 0x162   :  { %486 = vrot.lane.b32.xlu1 %v1982_v3, %s1784_s27  ;;  %484 = vrot.lane.b32.xlu0 %v1979_v31, %s1784_s27 }
 0x166   :  { %559 = vrot.lane.b32.xlu1 %v1972_v30, %s1785_s28  ;;  %557 = vrot.lane.b32.xlu0 %v1969_v29, %s1785_s28 }
 0x16a   :  { %563 = vrot.lane.b32.xlu1 %v1982_v3, %s1785_s28  ;;  %561 = vrot.lane.b32.xlu0 %v1979_v31, %s1785_s28 }
 0x16e   :  { %636 = vrot.lane.b32.xlu1 %v1972_v30, %s1786_s29  ;;  %634 = vrot.lane.b32.xlu0 %v1969_v29, %s1786_s29 }
 0x172   :  { %640 = vrot.lane.b32.xlu1 %v1982_v3, %s1786_s29  ;;  %638 = vrot.lane.b32.xlu0 %v1979_v31, %s1786_s29 }
 0x176   :  { %713 = vrot.lane.b32.xlu1 %v1972_v30, %s1787_s30  ;;  %711 = vrot.lane.b32.xlu0 %v1969_v29, %s1787_s30 }
 0x17a   :  { %717 = vrot.lane.b32.xlu1 %v1982_v3, %s1787_s30  ;;  %715 = vrot.lane.b32.xlu0 %v1979_v31, %s1787_s30 }
 0x1b0   :  { %v153_v37 = vpop.permute.xlu1 %152  ;;  %v151_v39 = vpop.permute.xlu0 %150 }
 0x1b1   :  { %v163_v63 = vsel %vm160_vm1, %v151_v39, %v153_v37 }
 0x1b4   :  { %v157_v40 = vpop.permute.xlu1 %156  ;;  %v155_v41 = vpop.permute.xlu0 %154 }
 0x1b5   :  { %v161_v43 = vsel %vm160_vm1, %v155_v41, %v157_v40  ;;  %v164_v26 = vsel %vm160_vm1, %v157_v40, %v151_v39  ;;  %v162_v30 = vsel %vm160_vm1, %v153_v37, %v155_v41  ;;  %v2162_v39 = vld [vmem:[%s2888_s3 + $0x18] sm:$0xf]  ;;  %v188_v40 = vmul.f32 %v2069_v0, %v163_v63  ;;  %v2181_v37 = vld [vmem:[%s2888_s3 + $0x1c] sm:$0xf] }
 0x1b6   :  { %v187_v29 = vmul.f32 %v2072_v45, %v164_v26  ;;  %v189_v41 = vmul.f32 %v2075_v46, %v162_v30  ;;  %v190_v28 = vmul.f32 %v2078_v47, %v161_v43 }
 0x1b8   :  { %v231_v48 = vpop.permute.xlu1 %230  ;;  %v229_v49 = vpop.permute.xlu0 %228 }
 0x1b9   :  { %v239_v42 = vsel %vm236_vm2, %v229_v49, %v231_v48 }
 0x1ba   :  { %v265_v24 = vmul.f32 %v251_v50, %v239_v42  ;;  %v204_v42 = vrot.slane %v187_v29, %v1847_v7 }
 0x1bc   :  { %v235_v1 = vpop.permute.xlu1 %234  ;;  %v233_v2 = vpop.permute.xlu0 %232  ;;  %v285_v29 = vrot.slane %v265_v24, %v1847_v7  ;;  %v217_v24 = vmul.f32 %v204_v42, %v2044_v32 }
 0x1bd   :  { %v240_v3 = vsel %vm236_vm2, %v235_v1, %v229_v49  ;;  %v238_v26 = vsel %vm236_vm2, %v231_v48, %v233_v2  ;;  %v2199_v48 = vld [vmem:[%s2888_s3 + $0x20] sm:$0xf]  ;;  %v208_v49 = vrot.slane %v188_v40, %v1847_v7  ;;  %v237_v43 = vsel %vm236_vm2, %v233_v2, %v235_v1 }
 0x1be   :  { %v264_v23 = vmul.f32 %v247_v51, %v240_v3  ;;  %v266_v63 = vmul.f32 %v255_v52, %v238_v26  ;;  %v212_v40 = vrot.slane %v189_v41, %v1847_v7  ;;  %v216_v52 = vrot.slane %v190_v28, %v1847_v7 }
 0x1bf   :  { %v2910_v3 = vrot.slane %v2066_v44, %v1853_v10  ;;  %v218_v47 = vmul.f32 %v208_v49, %v2044_v32  ;;  %v2228_v1 = vmul.f32 %v208_v49, %v1935_v4  ;;  %v221_v44 = vmul.f32 %v204_v42, %v1935_v4 }
 0x1c0   :  { %v308_v31 = vpop.permute.xlu1 %307  ;;  %v306_v16 = vpop.permute.xlu0 %305  ;;  %v281_v2 = vrot.slane %v264_v23, %v1847_v7  ;;  %v219_v30 = vmul.f32 %v212_v40, %v2044_v32  ;;  %v223_v49 = vmul.f32 %v212_v40, %v1935_v4  ;;  %v220_v50 = vmul.f32 %v216_v52, %v2044_v32 }
 0x1c1   :  { %v267_v26 = vmul.f32 %v2910_v3, %v237_v43  ;;  %2911 = vst [vmem:[#allocation13_spill] sm:$0xff] %v2228_v1  ;;  %v289_v43 = vrot.slane %v266_v63, %v1847_v7  ;;  %v316_v3 = vsel %vm313_vm3, %v306_v16, %v308_v31  ;;  %v224_v42 = vmul.f32 %v216_v52, %v1935_v4 }
 0x1c2   :  { %v295_v63 = vmul.f32 %v285_v29, %v1937_v5  ;;  %v2249_v46 = vmul.f32 %v285_v29, %v1939_v6  ;;  %v294_v0 = vmul.f32 %v281_v2, %v1937_v5  ;;  %v2913_v40 = vrot.slane %v2090_v53, %v1849_v8 }
 0x1c3   :  { %v293_v45 = vrot.slane %v267_v26, %v1847_v7  ;;  %v298_v32 = vmul.f32 %v281_v2, %v1939_v6  ;;  %v296_v4 = vmul.f32 %v289_v43, %v1937_v5  ;;  %v2914_v52 = vrot.slane %v2090_v53, %v1847_v7 }
 0x1c4   :  { %v312_v27 = vpop.permute.xlu1 %311  ;;  %v310_v54 = vpop.permute.xlu0 %309  ;;  %2912 = vst [vmem:[#allocation14_spill] sm:$0xff] %v2249_v46  ;;  %v2915_v29 = vrot.slane %v2090_v53, %v1851_v9  ;;  %v300_v62 = vmul.f32 %v289_v43, %v1939_v6 }
 0x1c5   :  { %v317_v23 = vsel %vm313_vm3, %v312_v27, %v306_v16  ;;  %v315_v28 = vsel %vm313_vm3, %v308_v31, %v310_v54  ;;  %v342_v16 = vmul.f32 %v2913_v40, %v316_v3  ;;  %v314_v31 = vsel %vm313_vm3, %v310_v54, %v312_v27 }
 0x1c6   :  { %v341_v26 = vmul.f32 %v2914_v52, %v317_v23  ;;  %v343_v46 = vmul.f32 %v2915_v29, %v315_v28  ;;  %v297_v23 = vmul.f32 %v293_v45, %v1937_v5  ;;  %v2916_v40 = vrot.slane %v2090_v53, %v1853_v10 }
 0x1c7   :  { %v2917_v52 = vrot.slane %v2097_v55, %v1847_v7  ;;  %v2919_v5 = vrot.slane %v2097_v55, %v1853_v10  ;;  %v2290_v53 = vadd.f32 %v295_v63, %v218_v47  ;;  %v789_v47 = vadd.f32 %v298_v32, %v221_v44 }
 0x1c8   :  { %v385_v41 = vpop.permute.xlu1 %384  ;;  %v383_v51 = vpop.permute.xlu0 %382  ;;  %v344_v28 = vmul.f32 %v2916_v40, %v314_v31  ;;  %v358_v31 = vrot.slane %v341_v26, %v1847_v7  ;;  %v787_v63 = vadd.f32 %v296_v4, %v219_v30 }
 0x1c9   :  { %v393_v3 = vsel %vm390_vm4, %v383_v51, %v385_v41  ;;  %2920 = vst [vmem:[#allocation15_spill] sm:$0xff] %v2290_v53 }
 0x1ca   :  { %v370_v26 = vrot.slane %v344_v28, %v1847_v7  ;;  %v375_v4 = vmul.f32 %v358_v31, %v1943_v12 }
 0x1cc   :  { %v389_v1 = vpop.permute.xlu1 %388  ;;  %v387_v22 = vpop.permute.xlu0 %386 }
 0x1cd   :  { %v394_v54 = vsel %vm390_vm4, %v389_v1, %v383_v51  ;;  %v391_v27 = vsel %vm390_vm4, %v387_v22, %v389_v1  ;;  %v392_v2 = vsel %vm390_vm4, %v385_v41, %v387_v22  ;;  %v301_v1 = vmul.f32 %v293_v45, %v1939_v6 }
 0x1ce   :  { %v418_v29 = vmul.f32 %v2917_v52, %v394_v54  ;;  %v420_v51 = vmul.f32 %v2918_v36, %v392_v2  ;;  %v362_v22 = vrot.slane %v342_v16, %v1847_v7  ;;  %v421_v41 = vmul.f32 %v2919_v5, %v391_v27 }
 0x1cf   :  { %v2921_v54 = vrot.slane %v2097_v55, %v1849_v8  ;;  %v785_v45 = vadd.f32 %v294_v0, %v217_v24  ;;  %v366_v16 = vrot.slane %v343_v46, %v1847_v7  ;;  %v788_v55 = vadd.f32 %v297_v23, %v220_v50 }
 0x1d0   :  { %v435_v43 = vrot.slane %v418_v29, %v1847_v7  ;;  %v483_v2 = vpop.permute.xlu1 %482  ;;  %v481_v6 = vpop.permute.xlu0 %480  ;;  %v443_v40 = vrot.slane %v420_v51, %v1847_v7  ;;  %v447_v52 = vrot.slane %v421_v41, %v1847_v7  ;;  %v792_v5 = vadd.f32 %v301_v1, %v224_v42 }
 0x1d1   :  { %v419_v36 = vmul.f32 %v2921_v54, %v393_v3  ;;  %v491_v27 = vsel %vm488_vm5, %v481_v6, %v483_v2  ;;  %v791_v3 = vadd.f32 %v300_v62, %v223_v49  ;;  %v372_v29 = vmul.f32 %v362_v22, %v1941_v11 }
 0x1d2   :  { %v371_v0 = vmul.f32 %v358_v31, %v1941_v11  ;;  %v448_v24 = vmul.f32 %v435_v43, %v1945_v13  ;;  %v2922_v51 = vrot.slane %v2136_v15, %v1847_v7  ;;  %v373_v50 = vmul.f32 %v366_v16, %v1941_v11 }
 0x1d3   :  { %v439_v46 = vrot.slane %v419_v36, %v1847_v7  ;;  %v452_v62 = vmul.f32 %v435_v43, %v1947_v14  ;;  %v450_v49 = vmul.f32 %v443_v40, %v1945_v13  ;;  %v374_v42 = vmul.f32 %v370_v26, %v1941_v11 }
 0x1d4   :  { %v516_v44 = vmul.f32 %v2922_v51, %v491_v27  ;;  %v487_v30 = vpop.permute.xlu1 %486  ;;  %v485_v32 = vpop.permute.xlu0 %484  ;;  %v451_v23 = vmul.f32 %v447_v52, %v1945_v13  ;;  %v454_v28 = vmul.f32 %v443_v40, %v1947_v14  ;;  %v377_v41 = vmul.f32 %v366_v16, %v1943_v12 }
 0x1d5   :  { %v492_v1 = vsel %vm488_vm5, %v487_v30, %v481_v6  ;;  %v378_v31 = vmul.f32 %v370_v26, %v1943_v12  ;;  %v455_v54 = vmul.f32 %v447_v52, %v1947_v14  ;;  %v449_v43 = vmul.f32 %v439_v46, %v1945_v13 }
 0x1d6   :  { %v533_v36 = vrot.slane %v516_v44, %v1847_v7  ;;  %v793_v11 = vadd.f32 %v448_v24, %v371_v0  ;;  %v2923_v27 = vrot.slane %v2136_v15, %v1853_v10  ;;  %v489_v6 = vsel %vm488_vm5, %v485_v32, %v487_v30 }
 0x1d7   :  { %v797_v60 = vadd.f32 %v452_v62, %v375_v4  ;;  %v795_v16 = vadd.f32 %v450_v49, %v373_v50  ;;  %v490_v26 = vsel %vm488_vm5, %v483_v2, %v485_v32  ;;  %v2924_v52 = vrot.slane %v2136_v15, %v1851_v9 }
 0x1d8   :  { %v519_v40 = vmul.f32 %v2923_v27, %v492_v1  ;;  %v560_v51 = vpop.permute.xlu1 %559  ;;  %v558_v53 = vpop.permute.xlu0 %557  ;;  %v796_v13 = vadd.f32 %v451_v23, %v374_v42  ;;  %v799_v0 = vadd.f32 %v454_v28, %v377_v41  ;;  %v2339_v30 = vmul.f32 %v362_v22, %v1943_v12 }
 0x1d9   :  { %v518_v44 = vmul.f32 %v2924_v52, %v489_v6  ;;  %v568_v1 = vsel %vm565_vm6, %v558_v53, %v560_v51  ;;  %v800_v27 = vadd.f32 %v455_v54, %v378_v31  ;;  %v546_v4 = vmul.f32 %v533_v36, %v1953_v17 }
 0x1da   :  { %v545_v24 = vrot.slane %v519_v40, %v1847_v7  ;;  %v2925_v2 = vrot.slane %v2136_v15, %v1849_v8  ;;  %v2346_v50 = vmul.f32 %v439_v46, %v1947_v14  ;;  %v2348_v62 = vadd.f32 %v449_v43, %v372_v29 }
 0x1db   :  { %v2350_v49 = vadd.f32 %v793_v11, %v785_v45  ;;  %v541_v42 = vrot.slane %v518_v44, %v1847_v7  ;;  %v2353_v12 = vadd.f32 %v797_v60, %v789_v47  ;;  %v2355_v22 = vadd.f32 %v795_v16, %v787_v63 }
 0x1dc   :  { %v517_v32 = vmul.f32 %v2925_v2, %v490_v26  ;;  %v564_v23 = vpop.permute.xlu1 %563  ;;  %v562_v28 = vpop.permute.xlu0 %561  ;;  %v2926_v41 = vrot.slane %v2162_v39, %v1847_v7  ;;  %v2362_v46 = vadd.f32 %v796_v13, %v788_v55  ;;  %v2364_v29 = vadd.f32 %v799_v0, %v791_v3 }
 0x1dd   :  { %v569_v14 = vsel %vm565_vm6, %v564_v23, %v558_v53  ;;  %v550_v45 = vmul.f32 %v533_v36, %v1955_v18  ;;  %v549_v31 = vmul.f32 %v545_v24, %v1953_v17  ;;  %v2369_v60 = vadd.f32 %v800_v27, %v792_v5 }
 0x1de   :  { %v593_v15 = vmul.f32 %v2926_v41, %v568_v1  ;;  %v801_v47 = vadd.f32 %v546_v4, %v2101_v56  ;;  %v553_v63 = vmul.f32 %v545_v24, %v1955_v18  ;;  %v537_v54 = vrot.slane %v517_v32, %v1847_v7 }
 0x1df   :  { %v548_v53 = vmul.f32 %v541_v42, %v1953_v17  ;;  %v552_v55 = vmul.f32 %v541_v42, %v1955_v18  ;;  %v2927_v3 = vrot.slane %v2162_v39, %v1853_v10  ;;  %v566_v43 = vsel %vm565_vm6, %v562_v28, %v564_v23 }
 0x1e0   :  { %v637_v11 = vpop.permute.xlu1 %636  ;;  %v635_v5 = vpop.permute.xlu0 %634  ;;  %v610_v40 = vrot.slane %v593_v15, %v1847_v7  ;;  %v567_v56 = vsel %vm565_vm6, %v560_v51, %v562_v28  ;;  %v2928_v6 = vrot.slane %v2162_v39, %v1851_v9  ;;  %v805_v52 = vadd.f32 %v550_v45, %v2105_v57 }
 0x1e1   :  { %v596_v36 = vmul.f32 %v2927_v3, %v569_v14  ;;  %v645_v26 = vsel %vm642_vm7, %v635_v5, %v637_v11  ;;  %v804_v44 = vadd.f32 %v549_v31, %v2109_v58  ;;  %v2929_v0 = vrot.slane %v2181_v37, %v1847_v7 }
 0x1e2   :  { %v595_v16 = vmul.f32 %v2928_v6, %v566_v43  ;;  %v808_v1 = vadd.f32 %v553_v63, %v2113_v59  ;;  %v2397_v51 = vmul.f32 %v537_v54, %v1953_v17  ;;  %v2400_v27 = vmul.f32 %v537_v54, %v1955_v18 }
 0x1e3   :  { %v622_v13 = vrot.slane %v596_v36, %v1847_v7  ;;  %v670_v24 = vmul.f32 %v2929_v0, %v645_v26  ;;  %v2930_v4 = vrot.slane %v2162_v39, %v1849_v8  ;;  %v803_v58 = vadd.f32 %v548_v53, %v2121_v61 }
 0x1e4   :  { %v807_v2 = vadd.f32 %v552_v55, %v2140_v25  ;;  %v618_v32 = vrot.slane %v595_v16, %v1847_v7  ;;  %v641_v23 = vpop.permute.xlu1 %640  ;;  %v639_v59 = vpop.permute.xlu0 %638  ;;  %v623_v17 = vmul.f32 %v610_v40, %v2046_v33  ;;  %v627_v28 = vmul.f32 %v610_v40, %v1957_v19 }
 0x1e5   :  { %v594_v57 = vmul.f32 %v2930_v4, %v567_v56  ;;  %v687_v42 = vrot.slane %v670_v24, %v1847_v7  ;;  %v646_v18 = vsel %vm642_vm7, %v641_v23, %v635_v5  ;;  %v643_v39 = vsel %vm642_vm7, %v639_v59, %v641_v23 }
 0x1e6   :  { %v626_v61 = vmul.f32 %v622_v13, %v2046_v33  ;;  %v630_v25 = vmul.f32 %v622_v13, %v1957_v19  ;;  %v2931_v45 = vrot.slane %v2181_v37, %v1853_v10  ;;  %v644_v63 = vsel %vm642_vm7, %v637_v11, %v639_v59 }
 0x1e7   :  { %v700_v41 = vmul.f32 %v687_v42, %v2048_v34  ;;  %v704_v15 = vmul.f32 %v687_v42, %v1959_v20  ;;  %v614_v14 = vrot.slane %v594_v57, %v1847_v7  ;;  %v2932_v54 = vrot.slane %v2181_v37, %v1851_v9 }
 0x1e8   :  { %v673_v31 = vmul.f32 %v2931_v45, %v646_v18  ;;  %v625_v55 = vmul.f32 %v618_v32, %v2046_v33  ;;  %v2933_v43 = vrot.slane %v2181_v37, %v1849_v8  ;;  %v714_v40 = vpop.permute.xlu1 %713  ;;  %v712_v56 = vpop.permute.xlu0 %711  ;;  %v629_v6 = vmul.f32 %v618_v32, %v1957_v19 }
 0x1e9   :  { %v672_v53 = vmul.f32 %v2932_v54, %v643_v39  ;;  %v809_v3 = vadd.f32 %v700_v41, %v623_v17  ;;  %v813_v36 = vadd.f32 %v704_v15, %v627_v28  ;;  %v722_v26 = vsel %vm719_vm8, %v712_v56, %v714_v40 }
 0x1ea   :  { %v671_v5 = vmul.f32 %v2933_v43, %v644_v63  ;;  %v699_v16 = vrot.slane %v673_v31, %v1847_v7  ;;  %v2934_v4 = vrot.slane %v2199_v48, %v1847_v7  ;;  %v624_v59 = vmul.f32 %v614_v14, %v2046_v33 }
 0x1eb   :  { %v695_v11 = vrot.slane %v672_v53, %v1847_v7  ;;  %v825_v13 = vadd.f32 %v809_v3, %v801_v47  ;;  %v829_v0 = vadd.f32 %v813_v36, %v805_v52  ;;  %v628_v17 = vmul.f32 %v614_v14, %v1957_v19 }
 0x1ec   :  { %v691_v24 = vrot.slane %v671_v5, %v1847_v7  ;;  %v747_v37 = vmul.f32 %v2934_v4, %v722_v26  ;;  %v703_v57 = vmul.f32 %v699_v16, %v2048_v34  ;;  %v707_v42 = vmul.f32 %v699_v16, %v1959_v20  ;;  %v718_v28 = vpop.permute.xlu1 %717  ;;  %v2939_v26 = vld [vmem:[#allocation5_spill] sm:$0xff] }
 0x1ed   :  { %v702_v32 = vmul.f32 %v695_v11, %v2048_v34  ;;  %v706_v23 = vmul.f32 %v695_v11, %v1959_v20  ;;  %v833_v45 = vadd.f32 %v825_v13, %v2350_v49  ;;  %v837_v31 = vadd.f32 %v829_v0, %v2353_v12  ;;  %v2942_v0 = vld [vmem:[#allocation13_spill] sm:$0xff] }
 0x1ee   :  { %v701_v47 = vmul.f32 %v691_v24, %v2048_v34  ;;  %v705_v52 = vmul.f32 %v691_v24, %v1959_v20  ;;  %v812_v18 = vadd.f32 %v703_v57, %v626_v61  ;;  %v816_v39 = vadd.f32 %v707_v42, %v630_v25 }
 0x1ef   :  { %v811_v41 = vadd.f32 %v702_v32, %v625_v55  ;;  %v815_v15 = vadd.f32 %v706_v23, %v629_v6  ;;  %v764_v63 = vrot.slane %v747_v37, %v1847_v7  ;;  %v723_v33 = vsel %vm719_vm8, %v718_v28, %v712_v56  ;;  %v716_v55 = vpop.permute.xlu0 %715  ;;  %v2937_v56 = vld [vmem:[#allocation12_spill] sm:$0xff]  ;;  %v2944_v32 = vld [vmem:[#allocation15_spill] sm:$0xff] }
 0x1f0   :  { %v828_v54 = vadd.f32 %v812_v18, %v804_v44  ;;  %v832_v19 = vadd.f32 %v816_v39, %v808_v1  ;;  %v810_v53 = vadd.f32 %v701_v47, %v624_v59  ;;  %v814_v20 = vadd.f32 %v705_v52, %v628_v17 }
 0x1f1   :  { %v827_v14 = vadd.f32 %v811_v41, %v803_v58  ;;  %v831_v34 = vadd.f32 %v815_v15, %v807_v2  ;;  %v777_v61 = vmul.f32 %v764_v63, %v2050_v35  ;;  %v781_v25 = vmul.f32 %v764_v63, %v1961_v21  ;;  %v2936_v58 = vld [vmem:[#allocation11_spill] sm:$0xff] }
 0x1f2   :  { %v2935_v49 = vrot.slane %v2199_v48, %v1853_v10  ;;  %v836_v3 = vadd.f32 %v828_v54, %v2362_v46  ;;  %v840_v36 = vadd.f32 %v832_v19, %v2369_v60  ;;  %v798_v1 = vadd.f32 %v2346_v50, %v2339_v30 }
 0x1f3   :  { %v835_v44 = vadd.f32 %v827_v14, %v2355_v22  ;;  %v802_v2 = vadd.f32 %v2397_v51, %v2936_v58  ;;  %v841_v43 = vadd.f32 %v833_v45, %v777_v61  ;;  %v845_v5 = vadd.f32 %v837_v31, %v781_v25  ;;  %v2938_v22 = vld [vmem:[#allocation6_spill] sm:$0xff] }
 0x1f4   :  { %v750_v12 = vmul.f32 %v2935_v49, %v723_v33  ;;  %v806_v6 = vadd.f32 %v2400_v27, %v2937_v56  ;;  %v839_v16 = vadd.f32 %v831_v34, %v2364_v29  ;;  %v720_v46 = vsel %vm719_vm8, %v716_v55, %v718_v28  ;;  %v2943_v29 = vld [vmem:[#allocation14_spill] sm:$0xff] }
 0x1f5   :  { %v721_v60 = vsel %vm719_vm8, %v714_v40, %v716_v55  ;;  %v861_v11 = vadd.f32 %v2938_v22, %v841_v43  ;;  %v865_v30 = vadd.f32 %v2939_v26, %v845_v5  ;;  %v2940_v50 = vrot.slane %v2199_v48, %v1849_v8 }
 0x1f6   :  { %v2941_v13 = vrot.slane %v2199_v48, %v1851_v9  ;;  %v790_v24 = vadd.f32 %v2943_v29, %v2942_v0  ;;  %v826_v4 = vadd.f32 %v810_v53, %v802_v2  ;;  %v830_v37 = vadd.f32 %v814_v20, %v806_v6 }
 0x1f7   :  { %v748_v51 = vmul.f32 %v2940_v50, %v721_v60  ;;  %v776_v57 = vrot.slane %v750_v12, %v1847_v7  ;;  %vm869_vm9 = vcmp.ge.f32.partialorder %v861_v11, 0.0  ;;  %vm873_vm10 = vcmp.ge.f32.partialorder %v865_v30, 0.0 }
 0x1f8   :  { %v749_v27 = vmul.f32 %v2941_v13, %v720_v46  ;;  %v877_v40 = vmul.f32 0.01, %v861_v11  ;;  %v881_v42 = vmul.f32 0.01, %v865_v30  ;;  %v818_v23 = vadd.f32 %v2348_v62, %v2944_v32  ;;  %v1376_v46 = vld [vmem:[%s2889_s6 + $0x8] sm:$0xff] }
 0x1f9   :  { %v822_v59 = vadd.f32 %v798_v1, %v790_v24  ;;  %v768_v17 = vrot.slane %v748_v51, %v1847_v7  ;;  %v780_v62 = vmul.f32 %v776_v57, %v2050_v35  ;;  %v784_v15 = vmul.f32 %v776_v57, %v1961_v21  ;;  %v2946_v57 = vld [vmem:[#allocation9_spill] sm:$0xff] }
 0x1fa   :  { %v772_v48 = vrot.slane %v749_v27, %v1847_v7  ;;  %v2488_v47 = vsel %vm869_vm9, %v861_v11, %v877_v40  ;;  %v2490_v52 = vsel %vm873_vm10, %v865_v30, %v881_v42  ;;  %v834_v28 = vadd.f32 %v826_v4, %v818_v23  ;;  %v2945_v30 = vld [vmem:[#allocation7_spill] sm:$0xff]  ;;  %v1452_v4 = vld [vmem:[%s2890_s7 + $0x8] sm:$0xff] }
 0x1fb   :  { %v838_v18 = vadd.f32 %v830_v37, %v822_v59  ;;  %v778_v39 = vmul.f32 %v768_v17, %v2050_v35  ;;  %895 = vrot.lane.b32.xlu1 %v2490_v52, %s1780_s4  ;;  %v782_v45 = vmul.f32 %v768_v17, %v1961_v21  ;;  %893 = vrot.lane.b32.xlu0 %v2488_v47, %s1780_s4  ;;  %vm1463_vm9 = vcmask 130048   ;;  %v1451_v37 = vld [vmem:[%s2890_s7] sm:$0xff] }
 0x1fc   :  { %v779_v41 = vmul.f32 %v772_v48, %v2050_v35  ;;  %v783_v31 = vmul.f32 %v772_v48, %v1961_v21  ;;  %v844_v14 = vadd.f32 %v836_v3, %v780_v62  ;;  %v848_v34 = vadd.f32 %v840_v36, %v784_v15  ;;  %1690 = vmatprep.mubr.msk.f32.mxu0 %vm1463_vm9, %v1376_v46  ;;  %v2948_v62 = vld [vmem:[#allocation10_spill] sm:$0xff] }
 0x1fd   :  { %v842_v63 = vadd.f32 %v834_v28, %v778_v39  ;;  %v846_v54 = vadd.f32 %v838_v18, %v782_v45  ;;  %1692 = vmatprep.mubr.msk.f32.mxu1 %vm1463_vm9, %v1376_v46  ;;  %v2947_v18 = vld [vmem:[#allocation8_spill] sm:$0xff] }
 0x1fe   :  { %v843_v33 = vadd.f32 %v835_v44, %v779_v41  ;;  %v847_v19 = vadd.f32 %v839_v16, %v783_v31  ;;  %v864_v55 = vadd.f32 %v2938_v22, %v844_v14  ;;  %v868_v49 = vadd.f32 %v2939_v26, %v848_v34  ;;  %v1683_v31 = vld [vmem:[%s2888_s3 + $0x4] sm:$0xf] }
 0x1ff   :  { %v862_v53 = vadd.f32 %v2938_v22, %v842_v63  ;;  %v866_v20 = vadd.f32 %v2939_v26, %v846_v54  ;;  %v966_v34 = vrot.slane %v1683_v31, %v1849_v8 }
 0x200   :  { %v863_v35 = vadd.f32 %v2938_v22, %v843_v33  ;;  %v867_v61 = vadd.f32 %v2939_v26, %v847_v19  ;;  %v880_v1 = vmul.f32 0.01, %v864_v55  ;;  %v884_v58 = vmul.f32 0.01, %v868_v49 }
 0x201   :  { %vm870_vm11 = vcmp.ge.f32.partialorder %v862_v53, 0.0  ;;  %vm874_vm12 = vcmp.ge.f32.partialorder %v866_v20, 0.0  ;;  %v878_v21 = vmul.f32 0.01, %v862_v53  ;;  %v882_v25 = vmul.f32 0.01, %v866_v20 }
 0x202   :  { %v879_v12 = vmul.f32 0.01, %v863_v35  ;;  %v883_v44 = vmul.f32 0.01, %v867_v61  ;;  %vm871_vm13 = vcmp.ge.f32.partialorder %v863_v35, 0.0  ;;  %vm875_vm14 = vcmp.ge.f32.partialorder %v867_v61, 0.0 }
 0x203   :  { %v2508_v3 = vsel %vm870_vm11, %v862_v53, %v878_v21  ;;  %v2510_v36 = vsel %vm874_vm12, %v866_v20, %v882_v25  ;;  %vm872_vm15 = vcmp.ge.f32.partialorder %v864_v55, 0.0  ;;  %vm876_vm0 = vcmp.ge.f32.partialorder %v868_v49, 0.0 }
 0x204   :  { %899 = vrot.lane.b32.xlu1 %v2510_v36, %s1780_s4  ;;  %897 = vrot.lane.b32.xlu0 %v2508_v3, %s1780_s4  ;;  %v2516_v2 = vsel %vm871_vm13, %v863_v35, %v879_v12  ;;  %v2518_v43 = vsel %vm875_vm14, %v867_v61, %v883_v44  ;;  %v2524_v5 = vsel %vm872_vm15, %v864_v55, %v880_v1 }
 0x205   :  { %v2526_v56 = vsel %vm876_vm0, %v868_v49, %v884_v58  ;;  %v970_v55 = vrot.slane %v1683_v31, %v1851_v9 }
 0x208   :  { %903 = vrot.lane.b32.xlu1 %v2518_v43, %s1780_s4  ;;  %901 = vrot.lane.b32.xlu0 %v2516_v2, %s1780_s4 }
 0x20c   :  { %907 = vrot.lane.b32.xlu1 %v2526_v56, %s1780_s4  ;;  %905 = vrot.lane.b32.xlu0 %v2524_v5, %s1780_s4 }
 0x210   :  { %935 = vrot.lane.b32.xlu1 %v2490_v52, %s1781_s5  ;;  %933 = vrot.lane.b32.xlu0 %v2488_v47, %s1781_s5 }
 0x214   :  { %939 = vrot.lane.b32.xlu1 %v2510_v36, %s1781_s5  ;;  %937 = vrot.lane.b32.xlu0 %v2508_v3, %s1781_s5 }
 0x218   :  { %943 = vrot.lane.b32.xlu1 %v2518_v43, %s1781_s5  ;;  %941 = vrot.lane.b32.xlu0 %v2516_v2, %s1781_s5 }
 0x21c   :  { %947 = vrot.lane.b32.xlu1 %v2526_v56, %s1781_s5  ;;  %945 = vrot.lane.b32.xlu0 %v2524_v5, %s1781_s5 }
 0x220   :  { %997 = vrot.lane.b32.xlu1 %v2490_v52, %s1782_s25  ;;  %995 = vrot.lane.b32.xlu0 %v2488_v47, %s1782_s25 }
 0x224   :  { %1001 = vrot.lane.b32.xlu1 %v2510_v36, %s1782_s25  ;;  %999 = vrot.lane.b32.xlu0 %v2508_v3, %s1782_s25 }
 0x228   :  { %1005 = vrot.lane.b32.xlu1 %v2518_v43, %s1782_s25  ;;  %1003 = vrot.lane.b32.xlu0 %v2516_v2, %s1782_s25 }
 0x22c   :  { %1009 = vrot.lane.b32.xlu1 %v2526_v56, %s1782_s25  ;;  %1007 = vrot.lane.b32.xlu0 %v2524_v5, %s1782_s25 }
 0x230   :  { %1059 = vrot.lane.b32.xlu1 %v2490_v52, %s1783_s26  ;;  %1057 = vrot.lane.b32.xlu0 %v2488_v47, %s1783_s26 }
 0x234   :  { %1063 = vrot.lane.b32.xlu1 %v2510_v36, %s1783_s26  ;;  %1061 = vrot.lane.b32.xlu0 %v2508_v3, %s1783_s26 }
 0x238   :  { %1067 = vrot.lane.b32.xlu1 %v2518_v43, %s1783_s26  ;;  %1065 = vrot.lane.b32.xlu0 %v2516_v2, %s1783_s26 }
 0x23c   :  { %1071 = vrot.lane.b32.xlu1 %v2526_v56, %s1783_s26  ;;  %1069 = vrot.lane.b32.xlu0 %v2524_v5, %s1783_s26 }
 0x240   :  { %1129 = vrot.lane.b32.xlu1 %v2490_v52, %s1784_s27  ;;  %1127 = vrot.lane.b32.xlu0 %v2488_v47, %s1784_s27 }
 0x244   :  { %1133 = vrot.lane.b32.xlu1 %v2510_v36, %s1784_s27  ;;  %1131 = vrot.lane.b32.xlu0 %v2508_v3, %s1784_s27 }
 0x248   :  { %1137 = vrot.lane.b32.xlu1 %v2518_v43, %s1784_s27  ;;  %1135 = vrot.lane.b32.xlu0 %v2516_v2, %s1784_s27 }
 0x24c   :  { %1141 = vrot.lane.b32.xlu1 %v2526_v56, %s1784_s27  ;;  %1139 = vrot.lane.b32.xlu0 %v2524_v5, %s1784_s27 }
 0x250   :  { %1191 = vrot.lane.b32.xlu1 %v2490_v52, %s1785_s28  ;;  %1189 = vrot.lane.b32.xlu0 %v2488_v47, %s1785_s28 }
 0x254   :  { %1195 = vrot.lane.b32.xlu1 %v2510_v36, %s1785_s28  ;;  %1193 = vrot.lane.b32.xlu0 %v2508_v3, %s1785_s28 }
 0x258   :  { %1199 = vrot.lane.b32.xlu1 %v2518_v43, %s1785_s28  ;;  %1197 = vrot.lane.b32.xlu0 %v2516_v2, %s1785_s28 }
 0x25c   :  { %1203 = vrot.lane.b32.xlu1 %v2526_v56, %s1785_s28  ;;  %1201 = vrot.lane.b32.xlu0 %v2524_v5, %s1785_s28 }
 0x260   :  { %1253 = vrot.lane.b32.xlu1 %v2490_v52, %s1786_s29  ;;  %1251 = vrot.lane.b32.xlu0 %v2488_v47, %s1786_s29 }
 0x264   :  { %1257 = vrot.lane.b32.xlu1 %v2510_v36, %s1786_s29  ;;  %1255 = vrot.lane.b32.xlu0 %v2508_v3, %s1786_s29 }
 0x268   :  { %1261 = vrot.lane.b32.xlu1 %v2518_v43, %s1786_s29  ;;  %1259 = vrot.lane.b32.xlu0 %v2516_v2, %s1786_s29 }
 0x26c   :  { %1265 = vrot.lane.b32.xlu1 %v2526_v56, %s1786_s29  ;;  %1263 = vrot.lane.b32.xlu0 %v2524_v5, %s1786_s29 }
 0x26d   :  { %v896_v6 = vpop.permute.xlu1 %895  ;;  %v894_v16 = vpop.permute.xlu0 %893 }
 0x270   :  { %1315 = vrot.lane.b32.xlu1 %v2490_v52, %s1787_s30  ;;  %1313 = vrot.lane.b32.xlu0 %v2488_v47, %s1787_s30 }
 0x274   :  { %1319 = vrot.lane.b32.xlu1 %v2510_v36, %s1787_s30  ;;  %1317 = vrot.lane.b32.xlu0 %v2508_v3, %s1787_s30 }
 0x276   :  { %v900_v60 = vpop.permute.xlu1 %899  ;;  %v898_v22 = vpop.permute.xlu0 %897 }
 0x277   :  { %v914_v11 = vsel %vm160_vm1, %v896_v6, %v900_v60  ;;  %v913_v26 = vsel %vm160_vm1, %v894_v16, %v898_v22 }
 0x278   :  { %1323 = vrot.lane.b32.xlu1 %v2518_v43, %s1787_s30  ;;  %1321 = vrot.lane.b32.xlu0 %v2516_v2, %s1787_s30  ;;  %v918_v50 = vmul.f32 %v913_v26, %v2945_v30  ;;  %v922_v51 = vmul.f32 %v914_v11, %v2945_v30 }
 0x27a   :  { %v904_v13 = vpop.permute.xlu1 %903  ;;  %v902_v27 = vpop.permute.xlu0 %901  ;;  %v1694_v0 = vpack.c.bf16 %v922_v51, %v918_v50 }
 0x27b   :  { %v912_v29 = vsel %vm160_vm1, %v900_v60, %v904_v13  ;;  %v911_v24 = vsel %vm160_vm1, %v898_v22, %v902_v27 }
 0x27c   :  { %1327 = vrot.lane.b32.xlu1 %v2526_v56, %s1787_s30  ;;  %1325 = vrot.lane.b32.xlu0 %v2524_v5, %s1787_s30  ;;  %v923_v40 = vmul.f32 %v912_v29, %v2946_v57  ;;  %v919_v42 = vmul.f32 %v911_v24, %v2946_v57  ;;  %v1684_v24 = vld [vmem:[%s2888_s3 + $0x8] sm:$0xf] }
 0x27d   :  { %1695 = vmatprep.subr.bf16.mxu0 %v1694_v0 }
 0x27e   :  { %v908_v32 = vpop.permute.xlu1 %907  ;;  %v906_v23 = vpop.permute.xlu0 %905  ;;  %v1732_v14 = vpack.c.bf16 %v923_v40, %v919_v42 }
 0x27f   :  { %v910_v59 = vsel %vm160_vm1, %v904_v13, %v908_v32  ;;  %v916_v17 = vsel %vm160_vm1, %v908_v32, %v896_v6  ;;  %v909_v48 = vsel %vm160_vm1, %v902_v27, %v906_v23  ;;  %v915_v28 = vsel %vm160_vm1, %v906_v23, %v894_v16 }
 0x280   :  { %v921_v39 = vmul.f32 %v916_v17, %v2947_v18  ;;  %v917_v41 = vmul.f32 %v915_v28, %v2947_v18  ;;  %1460 = vperm.xlu1 %1776, %v1452_v4   ;;  %1455 = vperm.xlu0 %1775, %v1451_v37   ;;  %v920_v15 = vmul.f32 %v909_v48, %v2948_v62 }
 0x281   :  { %v924_v45 = vmul.f32 %v910_v59, %v2948_v62  ;;  %v962_v6 = vrot.slane %v1683_v31, %v1847_v7  ;;  %v974_v16 = vrot.slane %v1683_v31, %v1853_v10  ;;  %v1028_v32 = vrot.slane %v1684_v24, %v1849_v8 }
 0x282   :  { %v936_v63 = vpop.permute.xlu1 %935  ;;  %v934_v33 = vpop.permute.xlu0 %933  ;;  %v1696_v54 = vpack.c.bf16 %v921_v39, %v917_v41  ;;  %v1032_v39 = vrot.slane %v1684_v24, %v1851_v9 }
 0x283   :  { %v1730_v19 = vpack.c.bf16 %v924_v45, %v920_v15 }
 0x284   :  { %1697 = vmatpush1.bf16.msra.mxu0 %v1696_v54 }
 0x285   :  { %1731 = vmatprep.subr.bf16.mxu1 %v1730_v19 }
 0x286   :  { %1733 = vmatpush1.bf16.msra.mxu1 %v1732_v14  ;;  %v940_v53 = vpop.permute.xlu1 %939  ;;  %v938_v20 = vpop.permute.xlu0 %937 }
 0x287   :  { %v954_v35 = vsel %vm236_vm2, %v936_v63, %v940_v53  ;;  %v953_v61 = vsel %vm236_vm2, %v934_v33, %v938_v20 }
 0x288   :  { %v984_v21 = vmul.f32 %v966_v34, %v954_v35  ;;  %v980_v25 = vmul.f32 %v966_v34, %v953_v61 }
 0x28a   :  { %v944_v49 = vpop.permute.xlu1 %943  ;;  %v942_v12 = vpop.permute.xlu0 %941  ;;  %v1698_v44 = vpack.c.bf16 %v984_v21, %v980_v25 }
 0x28b   :  { %v952_v1 = vsel %vm236_vm2, %v940_v53, %v944_v49  ;;  %v951_v58 = vsel %vm236_vm2, %v938_v20, %v942_v12 }
 0x28c   :  { %1699 = vmatprep.subr.bf16.mxu0 %v1698_v44  ;;  %v985_v46 = vmul.f32 %v970_v55, %v952_v1  ;;  %v981_v60 = vmul.f32 %v970_v55, %v951_v58 }
 0x28e   :  { %v948_v22 = vpop.permute.xlu1 %947  ;;  %v946_v11 = vpop.permute.xlu0 %945  ;;  %v1736_v42 = vpack.c.bf16 %v985_v46, %v981_v60 }
 0x28f   :  { %v950_v26 = vsel %vm236_vm2, %v944_v49, %v948_v22  ;;  %v956_v30 = vsel %vm236_vm2, %v948_v22, %v936_v63  ;;  %v949_v50 = vsel %vm236_vm2, %v942_v12, %v946_v11  ;;  %v955_v51 = vsel %vm236_vm2, %v946_v11, %v934_v33  ;;  %v1685_v12 = vld [vmem:[%s2888_s3 + $0xc] sm:$0xf] }
 0x290   :  { %v983_v13 = vmul.f32 %v962_v6, %v956_v30  ;;  %v986_v27 = vmul.f32 %v974_v16, %v950_v26  ;;  %v979_v0 = vmul.f32 %v962_v6, %v955_v51  ;;  %v982_v29 = vmul.f32 %v974_v16, %v949_v50 }
 0x291   :  { %v1024_v63 = vrot.slane %v1684_v24, %v1847_v7  ;;  %v1036_v33 = vrot.slane %v1684_v24, %v1853_v10  ;;  %v1090_v46 = vrot.slane %v1685_v12, %v1849_v8  ;;  %v1094_v51 = vrot.slane %v1685_v12, %v1851_v9 }
 0x292   :  { %v998_v4 = vpop.permute.xlu1 %997  ;;  %v996_v37 = vpop.permute.xlu0 %995  ;;  %v1700_v57 = vpack.c.bf16 %v983_v13, %v979_v0  ;;  %v1734_v40 = vpack.c.bf16 %v986_v27, %v982_v29 }
 0x294   :  { %1701 = vmatpush1.bf16.msra.mxu0 %v1700_v57  ;;  %1735 = vmatprep.subr.bf16.mxu1 %v1734_v40 }
 0x295   :  { %1737 = vmatpush1.bf16.msra.mxu1 %v1736_v42 }
 0x296   :  { %v1002_v23 = vpop.permute.xlu1 %1001  ;;  %v1000_v59 = vpop.permute.xlu0 %999 }
 0x297   :  { %v1016_v17 = vsel %vm313_vm3, %v998_v4, %v1002_v23  ;;  %v1015_v48 = vsel %vm313_vm3, %v996_v37, %v1000_v59 }
 0x298   :  { %v1046_v28 = vmul.f32 %v1028_v32, %v1016_v17  ;;  %v1042_v18 = vmul.f32 %v1028_v32, %v1015_v48 }
 0x29a   :  { %v1006_v41 = vpop.permute.xlu1 %1005  ;;  %v1004_v62 = vpop.permute.xlu0 %1003  ;;  %v1702_v15 = vpack.c.bf16 %v1046_v28, %v1042_v18 }
 0x29b   :  { %v1014_v45 = vsel %vm313_vm3, %v1002_v23, %v1006_v41  ;;  %v1013_v31 = vsel %vm313_vm3, %v1000_v59, %v1004_v62 }
 0x29c   :  { %1703 = vmatprep.subr.bf16.mxu0 %v1702_v15  ;;  %v1047_v54 = vmul.f32 %v1032_v39, %v1014_v45  ;;  %v1043_v19 = vmul.f32 %v1032_v39, %v1013_v31 }
 0x29e   :  { %v1010_v14 = vpop.permute.xlu1 %1009  ;;  %v1008_v34 = vpop.permute.xlu0 %1007  ;;  %v1740_v16 = vpack.c.bf16 %v1047_v54, %v1043_v19  ;;  %v1686_v54 = vld [vmem:[%s2888_s3 + $0x14] sm:$0xf]  ;;  %v1746_v19 = vpack.c.bf16 %v2526_v56, %v2524_v5 }
 0x29f   :  { %v1012_v53 = vsel %vm313_vm3, %v1006_v41, %v1010_v14  ;;  %v1018_v20 = vsel %vm313_vm3, %v1010_v14, %v998_v4  ;;  %v1011_v35 = vsel %vm313_vm3, %v1004_v62, %v1008_v34  ;;  %v1017_v61 = vsel %vm313_vm3, %v1008_v34, %v996_v37 }
 0x2a0   :  { %v1045_v21 = vmul.f32 %v1024_v63, %v1018_v20  ;;  %v1048_v25 = vmul.f32 %v1036_v33, %v1012_v53  ;;  %v1041_v55 = vmul.f32 %v1024_v63, %v1017_v61  ;;  %v1044_v49 = vmul.f32 %v1036_v33, %v1011_v35 }
 0x2a1   :  { %v1086_v4 = vrot.slane %v1685_v12, %v1847_v7  ;;  %v1098_v37 = vrot.slane %v1685_v12, %v1853_v10  ;;  %v1710_v63 = vpack.c.bf16 %v2510_v36, %v2508_v3  ;;  %v1156_v14 = vrot.slane %v1686_v54, %v1847_v7 }
 0x2a2   :  { %v1060_v44 = vpop.permute.xlu1 %1059  ;;  %v1058_v1 = vpop.permute.xlu0 %1057  ;;  %v1704_v58 = vpack.c.bf16 %v1045_v21, %v1041_v55  ;;  %v1738_v6 = vpack.c.bf16 %v1048_v25, %v1044_v49  ;;  %v1712_v3 = vpack.c.bf16 %v2490_v52, %v2488_v47  ;;  %v1748_v35 = vpack.c.bf16 %v2518_v43, %v2516_v2 }
 0x2a3   :  { %v1160_v5 = vrot.slane %v1686_v54, %v1849_v8  ;;  %v1164_v12 = vrot.slane %v1686_v54, %v1851_v9  ;;  %v1168_v2 = vrot.slane %v1686_v54, %v1853_v10 }
 0x2a4   :  { %1705 = vmatpush1.bf16.msra.mxu0 %v1704_v58  ;;  %1739 = vmatprep.subr.bf16.mxu1 %v1738_v6 }
 0x2a5   :  { %1741 = vmatpush1.bf16.msra.mxu1 %v1740_v16 }
 0x2a6   :  { %v1064_v60 = vpop.permute.xlu1 %1063  ;;  %v1062_v22 = vpop.permute.xlu0 %1061 }
 0x2a7   :  { %v1078_v11 = vsel %vm390_vm4, %v1060_v44, %v1064_v60  ;;  %v1077_v26 = vsel %vm390_vm4, %v1058_v1, %v1062_v22 }
 0x2a8   :  { %v1108_v30 = vmul.f32 %v1090_v46, %v1078_v11  ;;  %v1104_v50 = vmul.f32 %v1090_v46, %v1077_v26 }
 0x2aa   :  { %v1068_v13 = vpop.permute.xlu1 %1067  ;;  %v1066_v27 = vpop.permute.xlu0 %1065  ;;  %v1706_v0 = vpack.c.bf16 %v1108_v30, %v1104_v50 }
 0x2ab   :  { %v1076_v29 = vsel %vm390_vm4, %v1064_v60, %v1068_v13  ;;  %v1075_v24 = vsel %vm390_vm4, %v1062_v22, %v1066_v27 }
 0x2ac   :  { %1707 = vmatprep.subr.bf16.mxu0 %v1706_v0  ;;  %v1109_v57 = vmul.f32 %v1094_v51, %v1076_v29  ;;  %v1105_v40 = vmul.f32 %v1094_v51, %v1075_v24  ;;  %v1687_v0 = vld [vmem:[%s2888_s3 + $0x18] sm:$0xf] }
 0x2ad   :  { %v1218_v29 = vrot.slane %v1687_v0, %v1847_v7 }
 0x2ae   :  { %v1072_v42 = vpop.permute.xlu1 %1071  ;;  %v1070_v32 = vpop.permute.xlu0 %1069  ;;  %v1744_v33 = vpack.c.bf16 %v1109_v57, %v1105_v40  ;;  %v1222_v40 = vrot.slane %v1687_v0, %v1849_v8 }
 0x2af   :  { %v1074_v23 = vsel %vm390_vm4, %v1068_v13, %v1072_v42  ;;  %v1080_v59 = vsel %vm390_vm4, %v1072_v42, %v1060_v44  ;;  %v1073_v17 = vsel %vm390_vm4, %v1066_v27, %v1070_v32  ;;  %v1079_v48 = vsel %vm390_vm4, %v1070_v32, %v1058_v1 }
 0x2b0   :  { %v1107_v28 = vmul.f32 %v1086_v4, %v1080_v59  ;;  %v1110_v18 = vmul.f32 %v1098_v37, %v1074_v23  ;;  %v1103_v39 = vmul.f32 %v1086_v4, %v1079_v48  ;;  %v1106_v41 = vmul.f32 %v1098_v37, %v1073_v17 }
 0x2b2   :  { %v1130_v62 = vpop.permute.xlu1 %1129  ;;  %v1128_v15 = vpop.permute.xlu0 %1127  ;;  %v1708_v45 = vpack.c.bf16 %v1107_v28, %v1103_v39  ;;  %v1742_v31 = vpack.c.bf16 %v1110_v18, %v1106_v41  ;;  %v1226_v39 = vrot.slane %v1687_v0, %v1851_v9  ;;  %v1230_v41 = vrot.slane %v1687_v0, %v1853_v10 }
 0x2b4   :  { %1709 = vmatpush1.bf16.msra.mxu0 %v1708_v45  ;;  %1743 = vmatprep.subr.bf16.mxu1 %v1742_v31 }
 0x2b5   :  { %1711 = vmatprep.subr.bf16.mxu0 %v1710_v63  ;;  %1745 = vmatpush1.bf16.msra.mxu1 %v1744_v33 }
 0x2b6   :  { %v1134_v34 = vpop.permute.xlu1 %1133  ;;  %1747 = vmatprep.subr.bf16.mxu1 %v1746_v19  ;;  %v1132_v53 = vpop.permute.xlu0 %1131 }
 0x2b7   :  { %v1148_v36 = vsel %vm488_vm5, %v1130_v62, %v1134_v34  ;;  %v1147_v20 = vsel %vm488_vm5, %v1128_v15, %v1132_v53 }
 0x2b8   :  { %1713 = vmatpush1.bf16.msra.mxu0 %v1712_v3  ;;  %v1177_v56 = vmul.f32 %v1156_v14, %v1148_v36  ;;  %v1173_v61 = vmul.f32 %v1156_v14, %v1147_v20 }
 0x2b9   :  { %1749 = vmatpush1.bf16.msra.mxu1 %v1748_v35 }
 0x2ba   :  { %v1138_v21 = vpop.permute.xlu1 %1137  ;;  %v1136_v25 = vpop.permute.xlu0 %1135  ;;  %v1716_v58 = vpack.c.bf16 %v1177_v56, %v1173_v61  ;;  %v1688_v56 = vld [vmem:[%s2888_s3 + $0x1c] sm:$0xf] }
 0x2bb   :  { %v1146_v47 = vsel %vm488_vm5, %v1134_v34, %v1138_v21  ;;  %v1145_v52 = vsel %vm488_vm5, %v1132_v53, %v1136_v25  ;;  %v1280_v61 = vrot.slane %v1688_v56, %v1847_v7 }
 0x2bc   :  { %v1178_v55 = vmul.f32 %v1160_v5, %v1146_v47  ;;  %v1174_v49 = vmul.f32 %v1160_v5, %v1145_v52 }
 0x2be   :  { %v1142_v43 = vpop.permute.xlu1 %1141  ;;  %v1140_v44 = vpop.permute.xlu0 %1139  ;;  %v1714_v1 = vpack.c.bf16 %v1178_v55, %v1174_v49  ;;  %v1284_v55 = vrot.slane %v1688_v56, %v1849_v8 }
 0x2bf   :  { %v1144_v6 = vsel %vm488_vm5, %v1138_v21, %v1142_v43  ;;  %v1150_v16 = vsel %vm488_vm5, %v1142_v43, %v1130_v62  ;;  %v1143_v46 = vsel %vm488_vm5, %v1136_v25, %v1140_v44  ;;  %v1149_v60 = vsel %vm488_vm5, %v1140_v44, %v1128_v15 }
 0x2c0   :  { %v1179_v22 = vmul.f32 %v1164_v12, %v1144_v6  ;;  %v1180_v11 = vmul.f32 %v1168_v2, %v1150_v16  ;;  %v1175_v26 = vmul.f32 %v1164_v12, %v1143_v46  ;;  %v1176_v30 = vmul.f32 %v1168_v2, %v1149_v60  ;;  %1715 = vmatprep.subr.bf16.mxu0 %v1714_v1 }
 0x2c1   :  { %1717 = vmatpush1.bf16.msra.mxu0 %v1716_v58  ;;  %v1288_v16 = vrot.slane %v1688_v56, %v1851_v9  ;;  %v1292_v46 = vrot.slane %v1688_v56, %v1853_v10 }
 0x2c2   :  { %v1192_v50 = vpop.permute.xlu1 %1191  ;;  %v1190_v51 = vpop.permute.xlu0 %1189  ;;  %v1750_v13 = vpack.c.bf16 %v1180_v11, %v1176_v30  ;;  %v1752_v27 = vpack.c.bf16 %v1179_v22, %v1175_v26 }
 0x2c4   :  { %1751 = vmatprep.subr.bf16.mxu1 %v1750_v13 }
 0x2c5   :  { %1753 = vmatpush1.bf16.msra.mxu1 %v1752_v27 }
 0x2c6   :  { %v1196_v24 = vpop.permute.xlu1 %1195  ;;  %v1194_v4 = vpop.permute.xlu0 %1193 }
 0x2c7   :  { %v1210_v37 = vsel %vm565_vm6, %v1192_v50, %v1196_v24  ;;  %v1209_v57 = vsel %vm565_vm6, %v1190_v51, %v1194_v4 }
 0x2c8   :  { %v1239_v42 = vmul.f32 %v1218_v29, %v1210_v37  ;;  %v1235_v32 = vmul.f32 %v1218_v29, %v1209_v57 }
 0x2ca   :  { %v1200_v23 = vpop.permute.xlu1 %1199  ;;  %v1198_v59 = vpop.permute.xlu0 %1197  ;;  %v1720_v31 = vpack.c.bf16 %v1239_v42, %v1235_v32  ;;  %v1689_v42 = vld [vmem:[%s2888_s3 + $0x20] sm:$0xf] }
 0x2cb   :  { %v1208_v17 = vsel %vm565_vm6, %v1196_v24, %v1200_v23  ;;  %v1207_v48 = vsel %vm565_vm6, %v1194_v4, %v1198_v59  ;;  %v1342_v32 = vrot.slane %v1689_v42, %v1847_v7 }
 0x2cc   :  { %v1240_v28 = vmul.f32 %v1222_v40, %v1208_v17  ;;  %v1236_v18 = vmul.f32 %v1222_v40, %v1207_v48 }
 0x2ce   :  { %v1204_v62 = vpop.permute.xlu1 %1203  ;;  %v1202_v15 = vpop.permute.xlu0 %1201  ;;  %v1718_v45 = vpack.c.bf16 %v1240_v28, %v1236_v18  ;;  %v1346_v28 = vrot.slane %v1689_v42, %v1849_v8 }
 0x2cf   :  { %v1206_v63 = vsel %vm565_vm6, %v1200_v23, %v1204_v62  ;;  %v1212_v33 = vsel %vm565_vm6, %v1204_v62, %v1192_v50  ;;  %v1205_v54 = vsel %vm565_vm6, %v1198_v59, %v1202_v15  ;;  %v1211_v19 = vsel %vm565_vm6, %v1202_v15, %v1190_v51 }
 0x2d0   :  { %v1241_v14 = vmul.f32 %v1226_v39, %v1206_v63  ;;  %v1242_v34 = vmul.f32 %v1230_v41, %v1212_v33  ;;  %v1237_v53 = vmul.f32 %v1226_v39, %v1205_v54  ;;  %v1238_v3 = vmul.f32 %v1230_v41, %v1211_v19  ;;  %1719 = vmatprep.subr.bf16.mxu0 %v1718_v45 }
 0x2d1   :  { %1721 = vmatpush1.bf16.msra.mxu0 %v1720_v31  ;;  %v1350_v63 = vrot.slane %v1689_v42, %v1851_v9  ;;  %v1354_v33 = vrot.slane %v1689_v42, %v1853_v10 }
 0x2d2   :  { %v1254_v36 = vpop.permute.xlu1 %1253  ;;  %v1252_v20 = vpop.permute.xlu0 %1251  ;;  %v1754_v35 = vpack.c.bf16 %v1242_v34, %v1238_v3  ;;  %v1756_v5 = vpack.c.bf16 %v1241_v14, %v1237_v53 }
 0x2d4   :  { %1755 = vmatprep.subr.bf16.mxu1 %v1754_v35 }
 0x2d5   :  { %1757 = vmatpush1.bf16.msra.mxu1 %v1756_v5  ;;  %v1375_v5 = vld [vmem:[%s2889_s6] sm:$0xff] }
 0x2d6   :  { %v1258_v21 = vpop.permute.xlu1 %1257  ;;  %v1256_v25 = vpop.permute.xlu0 %1255 }
 0x2d7   :  { %v1272_v47 = vsel %vm642_vm7, %v1254_v36, %v1258_v21  ;;  %v1271_v52 = vsel %vm642_vm7, %v1252_v20, %v1256_v25 }
 0x2d8   :  { %v1301_v49 = vmul.f32 %v1280_v61, %v1272_v47  ;;  %v1297_v12 = vmul.f32 %v1280_v61, %v1271_v52 }
 0x2da   :  { %v1262_v2 = vpop.permute.xlu1 %1261  ;;  %v1260_v43 = vpop.permute.xlu0 %1259  ;;  %v1724_v26 = vpack.c.bf16 %v1301_v49, %v1297_v12 }
 0x2db   :  { %v1270_v44 = vsel %vm642_vm7, %v1258_v21, %v1262_v2  ;;  %v1269_v1 = vsel %vm642_vm7, %v1256_v25, %v1260_v43  ;;  %v1378_v21 = vld [vmem:[%s2889_s6 + $0x18] sm:$0xff] }
 0x2dc   :  { %v1302_v58 = vmul.f32 %v1284_v55, %v1270_v44  ;;  %v1298_v6 = vmul.f32 %v1284_v55, %v1269_v1 }
 0x2de   :  { %v1266_v60 = vpop.permute.xlu1 %1265  ;;  %v1264_v22 = vpop.permute.xlu0 %1263  ;;  %v1722_v11 = vpack.c.bf16 %v1302_v58, %v1298_v6 }
 0x2df   :  { %v1268_v30 = vsel %vm642_vm7, %v1262_v2, %v1266_v60  ;;  %v1274_v50 = vsel %vm642_vm7, %v1266_v60, %v1254_v36  ;;  %v1267_v51 = vsel %vm642_vm7, %v1260_v43, %v1264_v22  ;;  %v1273_v13 = vsel %vm642_vm7, %v1264_v22, %v1252_v20 }
 0x2e0   :  { %v1303_v27 = vmul.f32 %v1288_v16, %v1268_v30  ;;  %v1304_v0 = vmul.f32 %v1292_v46, %v1274_v50  ;;  %v1299_v29 = vmul.f32 %v1288_v16, %v1267_v51  ;;  %v1300_v24 = vmul.f32 %v1292_v46, %v1273_v13  ;;  %1723 = vmatprep.subr.bf16.mxu0 %v1722_v11 }
 0x2e1   :  { %1725 = vmatpush1.bf16.msra.mxu0 %v1724_v26 }
 0x2e2   :  { %v1316_v4 = vpop.permute.xlu1 %1315  ;;  %v1314_v37 = vpop.permute.xlu0 %1313  ;;  %v1758_v57 = vpack.c.bf16 %v1304_v0, %v1300_v24  ;;  %v1760_v40 = vpack.c.bf16 %v1303_v27, %v1299_v29 }
 0x2e4   :  { %1759 = vmatprep.subr.bf16.mxu1 %v1758_v57 }
 0x2e5   :  { %1761 = vmatpush1.bf16.msra.mxu1 %v1760_v40 }
 0x2e6   :  { %v1320_v23 = vpop.permute.xlu1 %1319  ;;  %v1318_v59 = vpop.permute.xlu0 %1317 }
 0x2e7   :  { %v1334_v17 = vsel %vm719_vm8, %v1316_v4, %v1320_v23  ;;  %v1333_v48 = vsel %vm719_vm8, %v1314_v37, %v1318_v59 }
 0x2e8   :  { %v1363_v18 = vmul.f32 %v1342_v32, %v1334_v17  ;;  %v1359_v39 = vmul.f32 %v1342_v32, %v1333_v48 }
 0x2ea   :  { %v1324_v41 = vpop.permute.xlu1 %1323  ;;  %v1322_v62 = vpop.permute.xlu0 %1321  ;;  %v1728_v8 = vpack.c.bf16 %v1363_v18, %v1359_v39 }
 0x2eb   :  { %v1332_v15 = vsel %vm719_vm8, %v1320_v23, %v1324_v41  ;;  %v1331_v7 = vsel %vm719_vm8, %v1318_v59, %v1322_v62 }
 0x2ec   :  { %v1364_v45 = vmul.f32 %v1346_v28, %v1332_v15  ;;  %v1360_v31 = vmul.f32 %v1346_v28, %v1331_v7 }
 0x2ee   :  { %v1328_v54 = vpop.permute.xlu1 %1327  ;;  %v1326_v19 = vpop.permute.xlu0 %1325  ;;  %v1726_v14 = vpack.c.bf16 %v1364_v45, %v1360_v31 }
 0x2ef   :  { %v1330_v34 = vsel %vm719_vm8, %v1324_v41, %v1328_v54  ;;  %v1336_v53 = vsel %vm719_vm8, %v1328_v54, %v1316_v4  ;;  %v1329_v3 = vsel %vm719_vm8, %v1322_v62, %v1326_v19  ;;  %v1335_v36 = vsel %vm719_vm8, %v1326_v19, %v1314_v37 }
 0x2f0   :  { %v1365_v20 = vmul.f32 %v1350_v63, %v1330_v34  ;;  %v1366_v9 = vmul.f32 %v1354_v33, %v1336_v53  ;;  %v1361_v35 = vmul.f32 %v1350_v63, %v1329_v3  ;;  %v1362_v10 = vmul.f32 %v1354_v33, %v1335_v36  ;;  %1727 = vmatprep.subr.bf16.mxu0 %v1726_v14 }
 0x2f1   :  { %1729 = vmatpush1.bf16.msra.mxu0 %v1728_v8 }
 0x2f2   :  { %v1762_v56 = vpack.c.bf16 %v1366_v9, %v1362_v10  ;;  %v1764_v61 = vpack.c.bf16 %v1365_v20, %v1361_v35 }
 0x2f4   :  { %1535 = vmatmul.mubr.f32.vlgmr.msra.gmra.mrb[0].mxu0 %v1375_v5  ;;  %1763 = vmatprep.subr.bf16.mxu1 %v1762_v56 }
 0x2f5   :  { %1765 = vmatpush1.bf16.msra.mxu1 %v1764_v61  ;;  %1691 = vmatprep.mubr.msk.f32.mxu0 %vm1463_vm9, %v1378_v21 }
 0x2f8   :  { %1541 = vmatmul.mubr.f32.gmra.mrb[2].mxu0 %v1377_v38  ;;  %1612 = vmatmul.mubr.f32.vlgmr.msra.gmra.mrb[0].mxu1 %v1375_v5 }
 0x2f9   :  { %1693 = vmatprep.mubr.msk.f32.mxu1 %vm1463_vm9, %v1378_v21 }
 0x2fc   :  { %1618 = vmatmul.mubr.f32.gmra.mrb[2].mxu1 %v1377_v38 }
 0x2ff   :  { %v1456_v25 = vpop.permute.xlu0 %1455  ;;  %v1461_v12 = vpop.permute.xlu1 %1460 }
 0x3c7   :  { %v1536_v47 = vpop.f32.mrb[0].mxu0 }
 0x3c8   :  { %v1537_v52 = vadd.f32 %v1536_v47, %v1456_v25  ;;  %v1538_v55 = vpop.f32.mrb[1].mxu0 }
 0x3c9   :  { %v1539_v49 = vadd.f32 %v1538_v55, %v1456_v25 }
 0x3ca   :  { %vm1624_vm1 = vcmp.ge.f32.partialorder %v1537_v52, 0.0  ;;  %v1632_v2 = vmul.f32 0.01, %v1537_v52 }
 0x3cb   :  { %vm1625_vm2 = vcmp.ge.f32.partialorder %v1539_v49, 0.0  ;;  %v1633_v43 = vmul.f32 0.01, %v1539_v49  ;;  %v1542_v44 = vpop.f32.mrb[2].mxu0  ;;  %v1613_v1 = vpop.f32.mrb[0].mxu1 }
 0x3cc   :  { %v1640_v58 = vsel %vm1624_vm1, %v1537_v52, %v1632_v2  ;;  %v1543_v6 = vadd.f32 %v1542_v44, %v1461_v12  ;;  %v1614_v16 = vadd.f32 %v1613_v1, %v1456_v25  ;;  %v1544_v46 = vpop.f32.mrb[3].mxu0  ;;  %v1615_v60 = vpop.f32.mrb[1].mxu1 }
 0x3cd   :  { %1648 = vst [vmem:[%s2891_s8] sm:$0xff] %v1640_v58  ;;  %v1641_v22 = vsel %vm1625_vm2, %v1539_v49, %v1633_v43  ;;  %v1545_v11 = vadd.f32 %v1544_v46, %v1461_v12  ;;  %v1616_v26 = vadd.f32 %v1615_v60, %v1456_v25 }
 0x3ce   :  { %1649 = vst [vmem:[%s2891_s8 + $0x8] sm:$0xff] %v1641_v22  ;;  %vm1628_vm3 = vcmp.ge.f32.partialorder %v1543_v6, 0.0  ;;  %v1636_v30 = vmul.f32 0.01, %v1543_v6  ;;  %vm1626_vm4 = vcmp.ge.f32.partialorder %v1614_v16, 0.0 }
 0x3cf   :  { %v1634_v50 = vmul.f32 0.01, %v1614_v16  ;;  %vm1629_vm5 = vcmp.ge.f32.partialorder %v1545_v11, 0.0  ;;  %v1637_v51 = vmul.f32 0.01, %v1545_v11  ;;  %vm1627_vm6 = vcmp.ge.f32.partialorder %v1616_v26, 0.0 }
 0x3d0   :  { %v1635_v13 = vmul.f32 0.01, %v1616_v26  ;;  %v1644_v27 = vsel %vm1628_vm3, %v1543_v6, %v1636_v30  ;;  %v1619_v29 = vpop.f32.mrb[2].mxu1 }
 0x3d1   :  { %v1642_v0 = vsel %vm1626_vm4, %v1614_v16, %v1634_v50  ;;  %1652 = vst [vmem:[%s2891_s8 + $0x20] sm:$0xff] %v1644_v27  ;;  %v1645_v24 = vsel %vm1629_vm5, %v1545_v11, %v1637_v51  ;;  %v1620_v37 = vadd.f32 %v1619_v29, %v1461_v12  ;;  %v1621_v57 = vpop.f32.mrb[3].mxu1 }
 0x3d2   :  { %1650 = vst [vmem:[%s2891_s8 + $0x10] sm:$0xff] %v1642_v0  ;;  %v1643_v4 = vsel %vm1627_vm6, %v1616_v26, %v1635_v13  ;;  %1653 = vst [vmem:[%s2891_s8 + $0x28] sm:$0xff] %v1645_v24  ;;  %v1622_v40 = vadd.f32 %v1621_v57, %v1461_v12 }
 0x3d3   :  { %1651 = vst [vmem:[%s2891_s8 + $0x18] sm:$0xff] %v1643_v4  ;;  %vm1630_vm7 = vcmp.ge.f32.partialorder %v1620_v37, 0.0  ;;  %v1638_v42 = vmul.f32 0.01, %v1620_v37 }
 0x3d4   :  { %vm1631_vm8 = vcmp.ge.f32.partialorder %v1622_v40, 0.0  ;;  %v1639_v32 = vmul.f32 0.01, %v1622_v40 }
 0x3d5   :  { %v1646_v23 = vsel %vm1630_vm7, %v1620_v37, %v1638_v42 }
 0x3d6   :  { %1654 = vst [vmem:[%s2891_s8 + $0x30] sm:$0xff] %v1646_v23  ;;  %v1647_v59 = vsel %vm1631_vm8, %v1622_v40, %v1639_v32 }
 0x3d7   :  { %1655 = vst [vmem:[%s2891_s8 + $0x38] sm:$0xff] %v1647_v59 }

</bundles_post_ra>
